<compile_context>
chip_gen: v7x
topology: tpu7x:2x2x1
jax: 0.10.0
libtpu: 0.0.40
codegen_flags: <defaults>
</compile_context>

<pallas_src>
import functools

import jax
import jax.numpy as jnp
from jax.experimental import pallas as pl
from jax.experimental.pallas import tpu as pltpu

LANE = 128
SUBLANE = 16      # bf16 sublane packing for the resident emb table
TILE_B = 256      # fills 256-wide MXU rows on v6e/v7x; 2x row-fill on v5e


def _round_up(x, m):
    return (x + m - 1) // m * m


def _generator_kernel(lab_ref, z_ref, emb_ref,
                      w1_ref, b1_ref, w2_ref, b2_ref, w3_ref, b3_ref,
                      out_ref):
    # ---- fused embedding gather: one-hot(labels) @ emb_table (bf16 MXU) -----
    labels = lab_ref[...]                                    # (TB, 1) int32
    tb = labels.shape[0]
    ncp = emb_ref.shape[0]
    onehot = (labels == jax.lax.broadcasted_iota(jnp.int32, (tb, ncp), 1)
              ).astype(jnp.bfloat16)                         # (TB, NCp) exact 0/1
    emb = jnp.dot(onehot, emb_ref[...],
                  preferred_element_type=jnp.float32)        # (TB, D) f32

    x = emb * z_ref[...]                                     # (TB, D) f32

    # ---- Linear 1 + LeakyReLU(0.2): bf16 operands, f32 accumulate ----------
    h = jnp.dot(x.astype(jnp.bfloat16), w1_ref[...],
                preferred_element_type=jnp.float32) + b1_ref[...]
    h = jnp.where(h > 0, h, 0.2 * h)                         # (TB, Hp)

    # ---- Linear 2 + LeakyReLU(0.2) ------------------------------------------
    h = jnp.dot(h.astype(jnp.bfloat16), w2_ref[...],
                preferred_element_type=jnp.float32) + b2_ref[...]
    h = jnp.where(h > 0, h, 0.2 * h)                         # (TB, Hp)

    # ---- Linear 3 + Tanh -----------------------------------------------------
    h = jnp.dot(h.astype(jnp.bfloat16), w3_ref[...],
                preferred_element_type=jnp.float32) + b3_ref[...]
    out_ref[...] = jnp.tanh(h)                               # (TB, D_out)


def prepare_params(params):
    """One-time conversion of PyTorch-layout params into kernel layout.

    Transposes weights to (in, out), pads only the hidden dim to a lane
    multiple and the emb-table rows to a sublane multiple, and casts matmul
    operands (weights + emb table) to bf16.  Do this once; reuse across calls.
    """
    NC, D = params["label_emb"].shape
    H = params["w1"].shape[0]
    D_out = params["w3"].shape[0]
    NCp = _round_up(NC, SUBLANE)
    Hp = _round_up(H, LANE)

    def pad2(a, rows, cols):
        return jnp.pad(a, ((0, rows - a.shape[0]), (0, cols - a.shape[1])))

    return {
        "emb": pad2(params["label_emb"], NCp, D).astype(jnp.bfloat16),   # (NCp, D)
        "w1": pad2(params["w1"].T, D, Hp).astype(jnp.bfloat16),          # (D, Hp)
        "b1": pad2(params["b1"].reshape(1, -1), 1, Hp),                  # (1, Hp) f32
        "w2": pad2(params["w2"].T, Hp, Hp).astype(jnp.bfloat16),         # (Hp, Hp)
        "b2": pad2(params["b2"].reshape(1, -1), 1, Hp),                  # (1, Hp) f32
        "w3": pad2(params["w3"].T, Hp, D_out).astype(jnp.bfloat16),      # (Hp, D_out)
        "b3": params["b3"].reshape(1, -1),                               # (1, D_out) f32
    }


@functools.partial(jax.jit, static_argnames=("tile_b",))
def generator_forward(z, labels, kparams, *, tile_b=TILE_B):
    """z: (B, input_dim) f32, labels: (B,) int, kparams: prepare_params(...)."""
    B, D = z.shape
    NCp = kparams["emb"].shape[0]
    Hp = kparams["w1"].shape[1]
    D_out = kparams["w3"].shape[1]

    # Pad only the batch (to a tile multiple); feature dims stream at full width.
    Bp = _round_up(B, tile_b)
    n_tiles = Bp // tile_b
    labels_i32 = labels.astype(jnp.int32)
    if Bp != B:
        z_in = jnp.pad(z, ((0, Bp - B), (0, 0)))
        lab_in = jnp.pad(labels_i32, (0, Bp - B)).reshape(Bp, 1)
    else:
        z_in = z
        lab_in = labels_i32.reshape(Bp, 1)

    grid_spec = pltpu.PrefetchScalarGridSpec(
        num_scalar_prefetch=0,
        grid=(n_tiles,),
        in_specs=[
            pl.BlockSpec((tile_b, 1), lambda i: (i, 0)),    # labels   (streamed)
            pl.BlockSpec((tile_b, D), lambda i: (i, 0)),    # z        (streamed, 32-wide)
            pl.BlockSpec((NCp, D), lambda i: (0, 0)),       # emb tbl  (resident, bf16)
            pl.BlockSpec((D, Hp), lambda i: (0, 0)),        # w1       (resident, bf16)
            pl.BlockSpec((1, Hp), lambda i: (0, 0)),        # b1       (resident)
            pl.BlockSpec((Hp, Hp), lambda i: (0, 0)),       # w2       (resident, bf16)
            pl.BlockSpec((1, Hp), lambda i: (0, 0)),        # b2       (resident)
            pl.BlockSpec((Hp, D_out), lambda i: (0, 0)),    # w3       (resident, bf16)
            pl.BlockSpec((1, D_out), lambda i: (0, 0)),     # b3       (resident)
        ],
        out_specs=pl.BlockSpec((tile_b, D_out), lambda i: (i, 0)),  # direct 32-wide store
    )

    # Advisory cost so XLA can overlap this tiny custom call with neighbors.
    flops = 2 * Bp * (NCp * D + D * Hp + Hp * Hp + Hp * D_out)
    transcendentals = Bp * D_out
    bytes_accessed = (
        Bp * (D * 4 + 4 + D_out * 4)                   # z + labels + out
        + NCp * D * 2 + D * Hp * 2 + Hp * Hp * 2 + Hp * D_out * 2  # bf16 weights
        + (Hp + Hp + D_out) * 4)                       # f32 biases

    out = pl.pallas_call(
        _generator_kernel,
        out_shape=jax.ShapeDtypeStruct((Bp, D_out), jnp.float32),
        grid_spec=grid_spec,
        compiler_params=pltpu.CompilerParams(
            dimension_semantics=("parallel",),          # batch tiles shard across TCs
            vmem_limit_bytes=32 * 1024 * 1024,
        ),
        cost_estimate=pl.CostEstimate(
            flops=flops,
            transcendentals=transcendentals,
            bytes_accessed=bytes_accessed,
        ),
    )(lab_in, z_in, kparams["emb"], kparams["w1"], kparams["b1"],
      kparams["w2"], kparams["b2"], kparams["w3"], kparams["b3"])

    return out if Bp == B else out[:B]


def init_params(key, input_dim, num_classes, hidden_dim):
    """Deterministic synthetic parameter init matching the module's shapes
    (PyTorch layout: weights are (out_features, in_features))."""
    ks = jax.random.split(key, 7)
    output_dim = input_dim  # module sets self.output_dim = input_dim
    return {
        "label_emb": jax.random.normal(ks[0], (num_classes, input_dim), jnp.float32),
        "w1": jax.random.normal(ks[1], (hidden_dim, input_dim), jnp.float32) * 0.05,
        "b1": jax.random.normal(ks[2], (hidden_dim,), jnp.float32) * 0.05,
        "w2": jax.random.normal(ks[3], (hidden_dim, hidden_dim), jnp.float32) * 0.05,
        "b2": jax.random.normal(ks[4], (hidden_dim,), jnp.float32) * 0.05,
        "w3": jax.random.normal(ks[5], (output_dim, hidden_dim), jnp.float32) * 0.05,
        "b3": jax.random.normal(ks[6], (output_dim,), jnp.float32) * 0.05,
    }


def reference_forward(z, labels, params):
    """Pure-JAX f32 reference mirroring the PyTorch forward."""
    emb = jnp.take(params["label_emb"], labels, axis=0)
    x = emb * z
    h = x @ params["w1"].T + params["b1"]
    h = jnp.where(h > 0, h, 0.2 * h)
    h = h @ params["w2"].T + params["b2"]
    h = jnp.where(h > 0, h, 0.2 * h)
    h = h @ params["w3"].T + params["b3"]
    return jnp.tanh(h)


if __name__ == "__main__":
    # Shapes consistent with the module: input_dim=32, hidden_dim=128 (default),
    # num_classes=10.  Batch = 2 tiles of 256 so the batch grid is exercised
    # and both v7x TensorCores get a tile.
    B, D, H, NC = 512, 32, 128, 10

    key = jax.random.PRNGKey(0)
    k_param, k_z, k_lab = jax.random.split(key, 3)

    params = init_params(k_param, input_dim=D, num_classes=NC, hidden_dim=H)
    kparams = prepare_params(params)  # one-time transpose / pad / bf16 cast
    z = jax.random.normal(k_z, (B, D), jnp.float32)
    labels = jax.random.randint(k_lab, (B,), 0, NC, jnp.int32)

    out = generator_forward(z, labels, kparams)
    out = jax.block_until_ready(out)

    ref = reference_forward(z, labels, params)
    assert out.shape == (B, D), out.shape
    max_err = float(jnp.max(jnp.abs(out - ref)))
    # bf16 matmul operands (f32 accumulate) -> loosened tolerance vs f32 reference.
    assert jnp.allclose(out, ref, atol=2e-2, rtol=2e-2), (
        f"mismatch vs reference, max abs err={max_err}")

    print("KERNEL_OK")
</pallas_src>

<mosaic_0001>
module attributes {stable_mosaic.version = 11 : i64} {
  func.func @_generator_kernel(%arg0: i32, %arg1: memref<256x1xi32, #tpu.memory_space<vmem>>, %arg2: memref<256x32xf32, #tpu.memory_space<vmem>>, %arg3: memref<16x32xbf16, #tpu.memory_space<vmem>>, %arg4: memref<32x128xbf16, #tpu.memory_space<vmem>>, %arg5: memref<1x128xf32, #tpu.memory_space<vmem>>, %arg6: memref<128x128xbf16, #tpu.memory_space<vmem>>, %arg7: memref<1x128xf32, #tpu.memory_space<vmem>>, %arg8: memref<128x32xbf16, #tpu.memory_space<vmem>>, %arg9: memref<1x32xf32, #tpu.memory_space<vmem>>, %arg10: memref<256x32xf32, #tpu.memory_space<vmem>>) attributes {dimension_semantics = [#tpu.dimension_semantics<parallel>], iteration_bounds = array<i64: 2>, scalar_prefetch = 0 : i64, scratch_operands = 0 : i64, tpu.core_type = #tpu.core_type<tc>, window_params = [{transform_indices = @transform_0, window_bounds = array<i64: 256, 1>}, {transform_indices = @transform_1, window_bounds = array<i64: 256, 32>}, {pipeline_mode = #tpu.pipeline_mode<synchronous>, transform_indices = @transform_2, window_bounds = array<i64: 16, 32>}, {pipeline_mode = #tpu.pipeline_mode<synchronous>, transform_indices = @transform_3, window_bounds = array<i64: 32, 128>}, {pipeline_mode = #tpu.pipeline_mode<synchronous>, transform_indices = @transform_4, window_bounds = array<i64: 1, 128>}, {pipeline_mode = #tpu.pipeline_mode<synchronous>, transform_indices = @transform_5, window_bounds = array<i64: 128, 128>}, {pipeline_mode = #tpu.pipeline_mode<synchronous>, transform_indices = @transform_6, window_bounds = array<i64: 1, 128>}, {pipeline_mode = #tpu.pipeline_mode<synchronous>, transform_indices = @transform_7, window_bounds = array<i64: 128, 32>}, {pipeline_mode = #tpu.pipeline_mode<synchronous>, transform_indices = @transform_8, window_bounds = array<i64: 1, 32>}, {transform_indices = @transform_9, window_bounds = array<i64: 256, 32>}]} {
    %c0 = arith.constant 0 : index
    %c0_0 = arith.constant 0 : index
    %0 = vector.load %arg1[%c0, %c0_0] : memref<256x1xi32, #tpu.memory_space<vmem>>, vector<256x1xi32>
    %1 = tpu.iota {dimensions = array<i32: 1>} : vector<256x16xi32>
    %2 = vector.broadcast %0 : vector<256x1xi32> to vector<256x16xi32>
    %3 = arith.cmpi eq, %2, %1 : vector<256x16xi32>
    %4 = arith.extui %3 : vector<256x16xi1> to vector<256x16xi32>
    %5 = arith.sitofp %4 : vector<256x16xi32> to vector<256x16xf32>
    %6 = arith.truncf %5 : vector<256x16xf32> to vector<256x16xbf16>
    %c0_1 = arith.constant 0 : index
    %c0_2 = arith.constant 0 : index
    %7 = vector.load %arg3[%c0_1, %c0_2] : memref<16x32xbf16, #tpu.memory_space<vmem>>, vector<16x32xbf16>
    %cst = arith.constant dense<0.000000e+00> : vector<256x32xf32>
    %8 = tpu.matmul %6, %7, %cst {dimension_numbers = #tpu.dot_dimension_numbers<[1], [0], [0], [1], [0, 0, 1, 1], [], []>} : vector<256x16xbf16>, vector<16x32xbf16>, vector<256x32xf32> -> vector<256x32xf32>
    %c0_3 = arith.constant 0 : index
    %c0_4 = arith.constant 0 : index
    %9 = vector.load %arg2[%c0_3, %c0_4] : memref<256x32xf32, #tpu.memory_space<vmem>>, vector<256x32xf32>
    %10 = arith.mulf %8, %9 : vector<256x32xf32>
    %11 = arith.truncf %10 : vector<256x32xf32> to vector<256x32xbf16>
    %c0_5 = arith.constant 0 : index
    %c0_6 = arith.constant 0 : index
    %12 = vector.load %arg4[%c0_5, %c0_6] : memref<32x128xbf16, #tpu.memory_space<vmem>>, vector<32x128xbf16>
    %cst_7 = arith.constant dense<0.000000e+00> : vector<256x128xf32>
    %13 = tpu.matmul %11, %12, %cst_7 {dimension_numbers = #tpu.dot_dimension_numbers<[1], [0], [0], [1], [0, 0, 1, 1], [], []>} : vector<256x32xbf16>, vector<32x128xbf16>, vector<256x128xf32> -> vector<256x128xf32>
    %c0_8 = arith.constant 0 : index
    %c0_9 = arith.constant 0 : index
    %14 = vector.load %arg5[%c0_8, %c0_9] : memref<1x128xf32, #tpu.memory_space<vmem>>, vector<1x128xf32>
    %15 = vector.broadcast %14 : vector<1x128xf32> to vector<256x128xf32>
    %16 = arith.addf %13, %15 : vector<256x128xf32>
    %cst_10 = arith.constant 0.000000e+00 : f32
    %17 = vector.broadcast %cst_10 : f32 to vector<256x128xf32>
    %18 = arith.cmpf ogt, %16, %17 : vector<256x128xf32>
    %cst_11 = arith.constant 2.000000e-01 : f32
    %19 = vector.broadcast %cst_11 : f32 to vector<256x128xf32>
    %20 = arith.mulf %19, %16 : vector<256x128xf32>
    %21 = arith.select %18, %16, %20 : vector<256x128xi1>, vector<256x128xf32>
    %22 = arith.truncf %21 : vector<256x128xf32> to vector<256x128xbf16>
    %c0_12 = arith.constant 0 : index
    %c0_13 = arith.constant 0 : index
    %23 = vector.load %arg6[%c0_12, %c0_13] : memref<128x128xbf16, #tpu.memory_space<vmem>>, vector<128x128xbf16>
    %cst_14 = arith.constant dense<0.000000e+00> : vector<256x128xf32>
    %24 = tpu.matmul %22, %23, %cst_14 {dimension_numbers = #tpu.dot_dimension_numbers<[1], [0], [0], [1], [0, 0, 1, 1], [], []>} : vector<256x128xbf16>, vector<128x128xbf16>, vector<256x128xf32> -> vector<256x128xf32>
    %c0_15 = arith.constant 0 : index
    %c0_16 = arith.constant 0 : index
    %25 = vector.load %arg7[%c0_15, %c0_16] : memref<1x128xf32, #tpu.memory_space<vmem>>, vector<1x128xf32>
    %26 = vector.broadcast %25 : vector<1x128xf32> to vector<256x128xf32>
    %27 = arith.addf %24, %26 : vector<256x128xf32>
    %cst_17 = arith.constant 0.000000e+00 : f32
    %28 = vector.broadcast %cst_17 : f32 to vector<256x128xf32>
    %29 = arith.cmpf ogt, %27, %28 : vector<256x128xf32>
    %cst_18 = arith.constant 2.000000e-01 : f32
    %30 = vector.broadcast %cst_18 : f32 to vector<256x128xf32>
    %31 = arith.mulf %30, %27 : vector<256x128xf32>
    %32 = arith.select %29, %27, %31 : vector<256x128xi1>, vector<256x128xf32>
    %33 = arith.truncf %32 : vector<256x128xf32> to vector<256x128xbf16>
    %c0_19 = arith.constant 0 : index
    %c0_20 = arith.constant 0 : index
    %34 = vector.load %arg8[%c0_19, %c0_20] : memref<128x32xbf16, #tpu.memory_space<vmem>>, vector<128x32xbf16>
    %cst_21 = arith.constant dense<0.000000e+00> : vector<256x32xf32>
    %35 = tpu.matmul %33, %34, %cst_21 {dimension_numbers = #tpu.dot_dimension_numbers<[1], [0], [0], [1], [0, 0, 1, 1], [], []>} : vector<256x128xbf16>, vector<128x32xbf16>, vector<256x32xf32> -> vector<256x32xf32>
    %c0_22 = arith.constant 0 : index
    %c0_23 = arith.constant 0 : index
    %36 = vector.load %arg9[%c0_22, %c0_23] : memref<1x32xf32, #tpu.memory_space<vmem>>, vector<1x32xf32>
    %37 = vector.broadcast %36 : vector<1x32xf32> to vector<256x32xf32>
    %38 = arith.addf %35, %37 : vector<256x32xf32>
    %39 = math.tanh %38 : vector<256x32xf32>
    %c0_24 = arith.constant 0 : index
    %c0_25 = arith.constant 0 : index
    %40 = vector.load %arg10[%c0_24, %c0_25] : memref<256x32xf32, #tpu.memory_space<vmem>>, vector<256x32xf32>
    tpu.vector_store %arg10[%c0_24, %c0_25], %39 {strides = array<i32>} : memref<256x32xf32, #tpu.memory_space<vmem>>, vector<256x32xf32>,
    return
  }
  func.func @transform_0(%arg0: i32) -> (i32, i32) {
    %c0_i32 = arith.constant 0 : i32
    %c0_i32_0 = arith.constant 0 : i32
    return %arg0, %c0_i32 : i32, i32
  }
  func.func @transform_1(%arg0: i32) -> (i32, i32) {
    %c0_i32 = arith.constant 0 : i32
    %c0_i32_0 = arith.constant 0 : i32
    return %arg0, %c0_i32 : i32, i32
  }
  func.func @transform_2(%arg0: i32) -> (i32, i32) {
    %c0_i32 = arith.constant 0 : i32
    %c0_i32_0 = arith.constant 0 : i32
    %c0_i32_1 = arith.constant 0 : i32
    return %c0_i32, %c0_i32_0 : i32, i32
  }
  func.func @transform_3(%arg0: i32) -> (i32, i32) {
    %c0_i32 = arith.constant 0 : i32
    %c0_i32_0 = arith.constant 0 : i32
    %c0_i32_1 = arith.constant 0 : i32
    return %c0_i32, %c0_i32_0 : i32, i32
  }
  func.func @transform_4(%arg0: i32) -> (i32, i32) {
    %c0_i32 = arith.constant 0 : i32
    %c0_i32_0 = arith.constant 0 : i32
    %c0_i32_1 = arith.constant 0 : i32
    return %c0_i32, %c0_i32_0 : i32, i32
  }
  func.func @transform_5(%arg0: i32) -> (i32, i32) {
    %c0_i32 = arith.constant 0 : i32
    %c0_i32_0 = arith.constant 0 : i32
    %c0_i32_1 = arith.constant 0 : i32
    return %c0_i32, %c0_i32_0 : i32, i32
  }
  func.func @transform_6(%arg0: i32) -> (i32, i32) {
    %c0_i32 = arith.constant 0 : i32
    %c0_i32_0 = arith.constant 0 : i32
    %c0_i32_1 = arith.constant 0 : i32
    return %c0_i32, %c0_i32_0 : i32, i32
  }
  func.func @transform_7(%arg0: i32) -> (i32, i32) {
    %c0_i32 = arith.constant 0 : i32
    %c0_i32_0 = arith.constant 0 : i32
    %c0_i32_1 = arith.constant 0 : i32
    return %c0_i32, %c0_i32_0 : i32, i32
  }
  func.func @transform_8(%arg0: i32) -> (i32, i32) {
    %c0_i32 = arith.constant 0 : i32
    %c0_i32_0 = arith.constant 0 : i32
    %c0_i32_1 = arith.constant 0 : i32
    return %c0_i32, %c0_i32_0 : i32, i32
  }
  func.func @transform_9(%arg0: i32) -> (i32, i32) {
    %c0_i32 = arith.constant 0 : i32
    %c0_i32_0 = arith.constant 0 : i32
    return %arg0, %c0_i32 : i32, i32
  }
}

</mosaic_0001>

<bundles_post_ra>
// kernel: generator_forward.1
= control target key start
LH: loop header
LB: loop body
LE: loop exit
PB: predicated region body
PF: predicated region fallthrough
CT: control target
= control target key end

     0   :  { %s2455_s30 = smov 0   ;;  %s2880_s0 = inlined_call_operand.vmem [shape: s32[512,1], index: 0, kind: input, shape index: {}]   ;;  %s2881_s1 = inlined_call_operand.vmem [shape: f32[512,32], index: 1, kind: input, shape index: {}]   ;;  %s2882_s2 = inlined_call_operand.vmem [shape: bf16[16,32], index: 2, kind: input, shape index: {}]   ;;  %s2883_s3 = inlined_call_operand.vmem [shape: bf16[32,128], index: 3, kind: input, shape index: {}]   ;;  %s2884_s4 = inlined_call_operand.vmem [shape: f32[1,128], index: 4, kind: input, shape index: {}]   ;;  %s2885_s5 = inlined_call_operand.vmem [shape: bf16[128,128], index: 5, kind: input, shape index: {}]   ;;  %s2886_s6 = inlined_call_operand.vmem [shape: f32[1,128], index: 6, kind: input, shape index: {}]   ;;  %s2887_s7 = inlined_call_operand.vmem [shape: bf16[128,32], index: 7, kind: input, shape index: {}]   ;;  %s2888_s8 = inlined_call_operand.vmem [shape: f32[1,32], index: 8, kind: input, shape index: {}]   ;;  %s2889_s9 = inlined_call_operand.vmem [shape: f32[512,32], index: 9, kind: output, shape index: {}]  }
   0x1 LB: > { %s1952_s10 = sadd.s32 4294967295, %s2401_s30   ;;  %p1956_p0 = scmp.ge.s32.totalorder %s2401_s30, 1  ;;  %s2401_s30 = sphi %s2455_s30, %s19_s30  }
   0x2   : > { %p299_p1 = scmp.lt.s32.totalorder %s2401_s30, 3 }
   0x4   : > { %p300_p2 = pnand %p1956_p0, %p299_p1 }
   0x5   : > { %s1957_s11 = sshll.u32 (!%p300_p2), %s1952_s10, 5  ;;  %v2403_v0 = vmov (!%p300_p2), 0   ;;  %v2312_v9 = vld [vmem:[%s2882_s2] sm:$0xff] (!%p300_p2)   ;;  %v391_v34 = vlaneseq (!%p300_p2)  ;;  %vm609_vm4 = vcmask (!%p300_p2), 130048   ;;  %v2404_v40 = vmov (!%p300_p2), 0.0  }
   0x6   : > { %303 = sbr.rel (%p300_p2) target bundleno = 1105 (0x451), region = 56  ;;  %2311 = vset.pattern.permute.xlu1 (!%p300_p2), %v2403_v0  ;;  %2310 = vset.pattern.permute.xlu0 (!%p300_p2), %v2403_v0  ;;  %p341_p3 = scmp.lt.s32.totalorder (!%p300_p2), %s1957_s11, 63 }
   0x7   : > { %2134 = vmatprep.subr.bf16.mxu0 (!%p300_p2), %v2312_v9  ;;  %v2506_v35 = vand.u32 (!%p300_p2), 127, %v391_v34 }
   0x8   : > { %2135 = vmatpush3.bf16.msra.mxu0 (!%p300_p2), %v2312_v9 }
   0xd   : > { %s2891_s11 = smov (!%p341_p3, %s1957_s11), 63 }
   0xe   : > { %s2463_s12 = sshll.u32 %s2891_s11, 3 }
   0xf   : > { %s2469_s15 = scalar_lea.vmem %s2880_s0, %s2463_s12  ;;  %s2619_s19 = scalar_lea.vmem %s2881_s1, %s2463_s12 }
  0x10   : > { %v361_v1 = vld [vmem:[%s2469_s15 + $0x10] sm:$0xff]  ;;  %v359_v2 = vld [vmem:[%s2469_s15] sm:$0xff]  ;;  %v362_v3 = vld [vmem:[%s2469_s15 + $0x18] sm:$0xff]  ;;  %s2785_s27 = scalar_lea.vmem %s2889_s9, %s2463_s12 }
  0x11   : > { %400 = vperm.xlu1 %2311, %v361_v1   ;;  %394 = vperm.xlu0 %2310, %v359_v2   ;;  %v360_v4 = vld [vmem:[%s2469_s15 + $0x8] sm:$0xff]  ;;  %v363_v6 = vld [vmem:[%s2469_s15 + $0x20] sm:$0xff]  ;;  %v366_v7 = vld [vmem:[%s2469_s15 + $0x38] sm:$0xff] }
  0x12   : > { %v364_v5 = vld [vmem:[%s2469_s15 + $0x28] sm:$0xff]  ;;  %v365_v8 = vld [vmem:[%s2469_s15 + $0x30] sm:$0xff]  ;;  %v367_v11 = vld [vmem:[%s2469_s15 + $0x40] sm:$0xff] }
  0x13   : > { %v368_v10 = vld [vmem:[%s2469_s15 + $0x48] sm:$0xff]  ;;  %v370_v12 = vld [vmem:[%s2469_s15 + $0x58] sm:$0xff]  ;;  %v369_v13 = vld [vmem:[%s2469_s15 + $0x50] sm:$0xff] }
  0x14   : > { %v372_v14 = vld [vmem:[%s2469_s15 + $0x68] sm:$0xff]  ;;  %v371_v15 = vld [vmem:[%s2469_s15 + $0x60] sm:$0xff]  ;;  %v374_v16 = vld [vmem:[%s2469_s15 + $0x78] sm:$0xff] }
  0x15   : > { %403 = vperm.xlu1 %2311, %v362_v3   ;;  %397 = vperm.xlu0 %2310, %v360_v4   ;;  %v373_v17 = vld [vmem:[%s2469_s15 + $0x70] sm:$0xff]  ;;  %v376_v18 = vld [vmem:[%s2469_s15 + $0x88] sm:$0xff]  ;;  %v375_v19 = vld [vmem:[%s2469_s15 + $0x80] sm:$0xff] }
  0x16   : > { %v378_v20 = vld [vmem:[%s2469_s15 + $0x98] sm:$0xff]  ;;  %v377_v21 = vld [vmem:[%s2469_s15 + $0x90] sm:$0xff]  ;;  %v380_v22 = vld [vmem:[%s2469_s15 + $0xa8] sm:$0xff] }
  0x17   : > { %v379_v23 = vld [vmem:[%s2469_s15 + $0xa0] sm:$0xff]  ;;  %v382_v24 = vld [vmem:[%s2469_s15 + $0xb8] sm:$0xff]  ;;  %v381_v25 = vld [vmem:[%s2469_s15 + $0xb0] sm:$0xff] }
  0x18   : > { %v384_v26 = vld [vmem:[%s2469_s15 + $0xc8] sm:$0xff]  ;;  %v383_v27 = vld [vmem:[%s2469_s15 + $0xc0] sm:$0xff]  ;;  %v386_v28 = vld [vmem:[%s2469_s15 + $0xd8] sm:$0xff] }
  0x19   : > { %409 = vperm.xlu1 %2311, %v364_v5   ;;  %406 = vperm.xlu0 %2310, %v363_v6   ;;  %v385_v29 = vld [vmem:[%s2469_s15 + $0xd0] sm:$0xff]  ;;  %v388_v30 = vld [vmem:[%s2469_s15 + $0xe8] sm:$0xff]  ;;  %v387_v31 = vld [vmem:[%s2469_s15 + $0xe0] sm:$0xff] }
  0x1a   : > { %v390_v32 = vld [vmem:[%s2469_s15 + $0xf8] sm:$0xff]  ;;  %v389_v33 = vld [vmem:[%s2469_s15 + $0xf0] sm:$0xff] }
  0x1d   : > { %415 = vperm.xlu1 %2311, %v366_v7   ;;  %412 = vperm.xlu0 %2310, %v365_v8  }
  0x21   : > { %421 = vperm.xlu1 %2311, %v368_v10   ;;  %418 = vperm.xlu0 %2310, %v367_v11  }
  0x25   : > { %427 = vperm.xlu1 %2311, %v370_v12   ;;  %424 = vperm.xlu0 %2310, %v369_v13  }
  0x29   : > { %433 = vperm.xlu1 %2311, %v372_v14   ;;  %430 = vperm.xlu0 %2310, %v371_v15  }
  0x2d   : > { %439 = vperm.xlu1 %2311, %v374_v16   ;;  %436 = vperm.xlu0 %2310, %v373_v17  }
  0x31   : > { %445 = vperm.xlu1 %2311, %v376_v18   ;;  %442 = vperm.xlu0 %2310, %v375_v19  }
  0x35   : > { %451 = vperm.xlu1 %2311, %v378_v20   ;;  %448 = vperm.xlu0 %2310, %v377_v21  }
  0x39   : > { %457 = vperm.xlu1 %2311, %v380_v22   ;;  %454 = vperm.xlu0 %2310, %v379_v23  }
  0x3d   : > { %463 = vperm.xlu1 %2311, %v382_v24   ;;  %460 = vperm.xlu0 %2310, %v381_v25  }
  0x41   : > { %469 = vperm.xlu1 %2311, %v384_v26   ;;  %466 = vperm.xlu0 %2310, %v383_v27  }
  0x45   : > { %475 = vperm.xlu1 %2311, %v386_v28   ;;  %472 = vperm.xlu0 %2310, %v385_v29  }
  0x49   : > { %481 = vperm.xlu1 %2311, %v388_v30   ;;  %478 = vperm.xlu0 %2310, %v387_v31  }
  0x4d   : > { %487 = vperm.xlu1 %2311, %v390_v32   ;;  %484 = vperm.xlu0 %2310, %v389_v33  }
  0x90   : > { %v401_v36 = vpop.permute.xlu1 %400  ;;  %v395_v37 = vpop.permute.xlu0 %394 }
  0x91   : > { %vm491_vm0 = vcmp.eq.s32.totalorder %v401_v36, %v2506_v35  ;;  %vm489_vm1 = vcmp.eq.s32.totalorder %v395_v37, %v2506_v35 }
  0x92   : > { %v1965_v41 = vsel %vm491_vm0, 1.0, %v2404_v40  ;;  %v1963_v42 = vsel %vm489_vm1, 1.0, %v2404_v40 }
  0x94   : > { %v404_v38 = vpop.permute.xlu1 %403  ;;  %v398_v39 = vpop.permute.xlu0 %397 }
  0x95   : > { %vm492_vm2 = vcmp.eq.s32.totalorder %v404_v38, %v2506_v35  ;;  %vm490_vm3 = vcmp.eq.s32.totalorder %v398_v39, %v2506_v35 }
  0x96   : > { %v1966_v43 = vsel %vm492_vm2, 1.0, %v2404_v40  ;;  %v1964_v44 = vsel %vm490_vm3, 1.0, %v2404_v40 }
  0x97   : > { %v586_v45 = vpack.c.bf16 %v1966_v43, %v1965_v41  ;;  %v585_v46 = vpack.c.bf16 %v1964_v44, %v1963_v42 }
  0x98   : > { %v410_v47 = vpop.permute.xlu1 %409  ;;  %v407_v48 = vpop.permute.xlu0 %406 }
  0x99   : > { %vm494_vm5 = vcmp.eq.s32.totalorder %v410_v47, %v2506_v35  ;;  %vm493_vm6 = vcmp.eq.s32.totalorder %v407_v48, %v2506_v35  ;;  %2136 = vmatprep.mubr.msk.bf16.mxu0 %vm609_vm4, %v585_v46 }
  0x9a   : > { %v1968_v49 = vsel %vm494_vm5, 1.0, %v2404_v40  ;;  %v1967_v50 = vsel %vm493_vm6, 1.0, %v2404_v40  ;;  %2137 = vmatmul.mubr.msk.bf16.vlgmr.msra.gmra.mrb[0].mxu0 %vm609_vm4, %v586_v45 }
  0x9b   : > { %v587_v51 = vpack.c.bf16 %v1968_v49, %v1967_v50 }
  0x9c   : > { %v416_v52 = vpop.permute.xlu1 %415  ;;  %v413_v53 = vpop.permute.xlu0 %412 }
  0x9d   : > { %vm496_vm7 = vcmp.eq.s32.totalorder %v416_v52, %v2506_v35  ;;  %vm495_vm8 = vcmp.eq.s32.totalorder %v413_v53, %v2506_v35  ;;  %2140 = vmatprep.mubr.msk.bf16.mxu0 %vm609_vm4, %v587_v51 }
  0x9e   : > { %v1970_v54 = vsel %vm496_vm7, 1.0, %v2404_v40  ;;  %v1969_v55 = vsel %vm495_vm8, 1.0, %v2404_v40 }
  0x9f   : > { %v588_v56 = vpack.c.bf16 %v1970_v54, %v1969_v55  ;;  %v2313_v55 = vld [vmem:[%s2883_s3] sm:$0xff]  }
  0xa0   : > { %v422_v57 = vpop.permute.xlu1 %421  ;;  %v419_v58 = vpop.permute.xlu0 %418  ;;  %2168 = vmatprep.subr.bf16.mxu1 %v2313_v55 }
  0xa1   : > { %vm498_vm9 = vcmp.eq.s32.totalorder %v422_v57, %v2506_v35  ;;  %vm497_vm10 = vcmp.eq.s32.totalorder %v419_v58, %v2506_v35  ;;  %2169 = vmatpush3.bf16.msra.mxu1 %v2313_v55  ;;  %v2317_v57 = vld [vmem:[%s2885_s5 + $0x10] sm:$0xff]   ;;  %v2318_v58 = vld [vmem:[%s2885_s5 + $0x18] sm:$0xff]  }
  0xa2   : > { %v1972_v59 = vsel %vm498_vm9, 1.0, %v2404_v40  ;;  %v1971_v60 = vsel %vm497_vm10, 1.0, %v2404_v40  ;;  %2141 = vmatmul.mubr.msk.bf16.gmra.mrb[4].mxu0 %vm609_vm4, %v588_v56  ;;  %v2314_v56 = vld [vmem:[%s2883_s3 + $0x8] sm:$0xff]  }
  0xa3   : > { %v589_v61 = vpack.c.bf16 %v1972_v59, %v1971_v60  ;;  %2170 = vmatprep.subr.bf16.mxu1 %v2314_v56  ;;  %v2319_v59 = vld [vmem:[%s2885_s5 + $0x20] sm:$0xff]   ;;  %v2320_v60 = vld [vmem:[%s2885_s5 + $0x28] sm:$0xff]  }
  0xa4   : > { %v428_v62 = vpop.permute.xlu1 %427  ;;  %v425_v63 = vpop.permute.xlu0 %424 }
  0xa5   : > { %vm500_vm11 = vcmp.eq.s32.totalorder %v428_v62, %v2506_v35  ;;  %vm499_vm12 = vcmp.eq.s32.totalorder %v425_v63, %v2506_v35  ;;  %2144 = vmatprep.mubr.msk.bf16.mxu0 %vm609_vm4, %v589_v61  ;;  %2171 = vmatpush3.bf16.msra.mxu1 %v2314_v56  ;;  %v2321_v61 = vld [vmem:[%s2885_s5 + $0x30] sm:$0xff]  }
  0xa6   : > { %v1974_v0 = vsel %vm500_vm11, 1.0, %v2404_v40  ;;  %v1973_v1 = vsel %vm499_vm12, 1.0, %v2404_v40  ;;  %v821_v63 = vld [vmem:[%s2619_s19 + $0x10] sm:$0xff] }
  0xa7   : > { %v590_v2 = vpack.c.bf16 %v1974_v0, %v1973_v1  ;;  %v822_v0 = vld [vmem:[%s2619_s19 + $0x18] sm:$0xff] }
  0xa8   : > { %v434_v3 = vpop.permute.xlu1 %433  ;;  %v431_v4 = vpop.permute.xlu0 %430 }
  0xa9   : > { %vm502_vm13 = vcmp.eq.s32.totalorder %v434_v3, %v2506_v35  ;;  %vm501_vm14 = vcmp.eq.s32.totalorder %v431_v4, %v2506_v35  ;;  %v820_v3 = vld [vmem:[%s2619_s19 + $0x8] sm:$0xff] }
  0xaa   : > { %v1976_v5 = vsel %vm502_vm13, 1.0, %v2404_v40  ;;  %v1975_v6 = vsel %vm501_vm14, 1.0, %v2404_v40  ;;  %2145 = vmatmul.mubr.msk.bf16.gmra.mrb[8].mxu0 %vm609_vm4, %v590_v2  ;;  %v819_v2 = vld [vmem:[%s2619_s19] sm:$0xff] }
  0xab   : > { %v591_v7 = vpack.c.bf16 %v1976_v5, %v1975_v6 }
  0xac   : > { %v440_v8 = vpop.permute.xlu1 %439  ;;  %v437_v9 = vpop.permute.xlu0 %436 }
  0xad   : > { %vm504_vm15 = vcmp.eq.s32.totalorder %v440_v8, %v2506_v35  ;;  %vm503_vm0 = vcmp.eq.s32.totalorder %v437_v9, %v2506_v35  ;;  %2148 = vmatprep.mubr.msk.bf16.mxu0 %vm609_vm4, %v591_v7 }
  0xae   : > { %v1978_v10 = vsel %vm504_vm15, 1.0, %v2404_v40  ;;  %v1977_v11 = vsel %vm503_vm0, 1.0, %v2404_v40 }
  0xaf   : > { %v592_v12 = vpack.c.bf16 %v1978_v10, %v1977_v11 }
  0xb0   : > { %v446_v13 = vpop.permute.xlu1 %445  ;;  %v443_v14 = vpop.permute.xlu0 %442 }
  0xb1   : > { %vm506_vm1 = vcmp.eq.s32.totalorder %v446_v13, %v2506_v35  ;;  %vm505_vm2 = vcmp.eq.s32.totalorder %v443_v14, %v2506_v35  ;;  %v825_v13 = vld [vmem:[%s2619_s19 + $0x30] sm:$0xff]  ;;  %v826_v14 = vld [vmem:[%s2619_s19 + $0x38] sm:$0xff] }
  0xb2   : > { %v1980_v15 = vsel %vm506_vm1, 1.0, %v2404_v40  ;;  %v1979_v16 = vsel %vm505_vm2, 1.0, %v2404_v40  ;;  %2149 = vmatmul.mubr.msk.bf16.gmra.mrb[12].mxu0 %vm609_vm4, %v592_v12 }
  0xb3   : > { %v593_v17 = vpack.c.bf16 %v1980_v15, %v1979_v16  ;;  %v823_v16 = vld [vmem:[%s2619_s19 + $0x20] sm:$0xff] }
  0xb4   : > { %v452_v18 = vpop.permute.xlu1 %451  ;;  %v449_v19 = vpop.permute.xlu0 %448 }
  0xb5   : > { %vm508_vm3 = vcmp.eq.s32.totalorder %v452_v18, %v2506_v35  ;;  %vm507_vm5 = vcmp.eq.s32.totalorder %v449_v19, %v2506_v35  ;;  %2152 = vmatprep.mubr.msk.bf16.mxu0 %vm609_vm4, %v593_v17  ;;  %v824_v17 = vld [vmem:[%s2619_s19 + $0x28] sm:$0xff] }
  0xb6   : > { %v1982_v20 = vsel %vm508_vm3, 1.0, %v2404_v40  ;;  %v1981_v21 = vsel %vm507_vm5, 1.0, %v2404_v40 }
  0xb7   : > { %v594_v22 = vpack.c.bf16 %v1982_v20, %v1981_v21 }
  0xb8   : > { %v458_v23 = vpop.permute.xlu1 %457  ;;  %v455_v24 = vpop.permute.xlu0 %454 }
  0xb9   : > { %vm510_vm6 = vcmp.eq.s32.totalorder %v458_v23, %v2506_v35  ;;  %vm509_vm7 = vcmp.eq.s32.totalorder %v455_v24, %v2506_v35 }
  0xba   : > { %v1984_v25 = vsel %vm510_vm6, 1.0, %v2404_v40  ;;  %v1983_v26 = vsel %vm509_vm7, 1.0, %v2404_v40  ;;  %2153 = vmatmul.mubr.msk.bf16.gmra.mrb[16].mxu0 %vm609_vm4, %v594_v22 }
  0xbb   : > { %v595_v27 = vpack.c.bf16 %v1984_v25, %v1983_v26 }
  0xbc   : > { %v464_v28 = vpop.permute.xlu1 %463  ;;  %v461_v29 = vpop.permute.xlu0 %460 }
  0xbd   : > { %vm512_vm8 = vcmp.eq.s32.totalorder %v464_v28, %v2506_v35  ;;  %vm511_vm9 = vcmp.eq.s32.totalorder %v461_v29, %v2506_v35  ;;  %2156 = vmatprep.mubr.msk.bf16.mxu0 %vm609_vm4, %v595_v27  ;;  %v829_v27 = vld [vmem:[%s2619_s19 + $0x50] sm:$0xff]  ;;  %v830_v28 = vld [vmem:[%s2619_s19 + $0x58] sm:$0xff] }
  0xbe   : > { %v1986_v30 = vsel %vm512_vm8, 1.0, %v2404_v40  ;;  %v1985_v31 = vsel %vm511_vm9, 1.0, %v2404_v40 }
  0xbf   : > { %v596_v32 = vpack.c.bf16 %v1986_v30, %v1985_v31  ;;  %v827_v30 = vld [vmem:[%s2619_s19 + $0x40] sm:$0xff]  ;;  %v828_v31 = vld [vmem:[%s2619_s19 + $0x48] sm:$0xff] }
  0xc0   : > { %v470_v33 = vpop.permute.xlu1 %469  ;;  %v467_v34 = vpop.permute.xlu0 %466 }
  0xc1   : > { %vm514_vm10 = vcmp.eq.s32.totalorder %v470_v33, %v2506_v35  ;;  %vm513_vm11 = vcmp.eq.s32.totalorder %v467_v34, %v2506_v35 }
  0xc2   : > { %v1988_v36 = vsel %vm514_vm10, 1.0, %v2404_v40  ;;  %v1987_v37 = vsel %vm513_vm11, 1.0, %v2404_v40  ;;  %2157 = vmatmul.mubr.msk.bf16.gmra.mrb[20].mxu0 %vm609_vm4, %v596_v32 }
  0xc3   : > { %v597_v38 = vpack.c.bf16 %v1988_v36, %v1987_v37 }
  0xc4   : > { %v476_v39 = vpop.permute.xlu1 %475  ;;  %v473_v41 = vpop.permute.xlu0 %472 }
  0xc5   : > { %vm516_vm12 = vcmp.eq.s32.totalorder %v476_v39, %v2506_v35  ;;  %vm515_vm13 = vcmp.eq.s32.totalorder %v473_v41, %v2506_v35  ;;  %2160 = vmatprep.mubr.msk.bf16.mxu0 %vm609_vm4, %v597_v38 }
  0xc6   : > { %v1990_v42 = vsel %vm516_vm12, 1.0, %v2404_v40  ;;  %v1989_v43 = vsel %vm515_vm13, 1.0, %v2404_v40 }
  0xc7   : > { %v598_v44 = vpack.c.bf16 %v1990_v42, %v1989_v43  ;;  %v833_v43 = vld [vmem:[%s2619_s19 + $0x70] sm:$0xff] }
  0xc8   : > { %v482_v45 = vpop.permute.xlu1 %481  ;;  %v479_v46 = vpop.permute.xlu0 %478 }
  0xc9   : > { %vm518_vm14 = vcmp.eq.s32.totalorder %v482_v45, %v2506_v35  ;;  %vm517_vm15 = vcmp.eq.s32.totalorder %v479_v46, %v2506_v35  ;;  %v831_v46 = vld [vmem:[%s2619_s19 + $0x60] sm:$0xff] }
  0xca   : > { %v1992_v47 = vsel %vm518_vm14, 1.0, %v2404_v40  ;;  %v1991_v48 = vsel %vm517_vm15, 1.0, %v2404_v40  ;;  %2161 = vmatmul.mubr.msk.bf16.gmra.mrb[24].mxu0 %vm609_vm4, %v598_v44  ;;  %v834_v44 = vld [vmem:[%s2619_s19 + $0x78] sm:$0xff] }
  0xcb   : > { %v599_v49 = vpack.c.bf16 %v1992_v47, %v1991_v48  ;;  %v832_v47 = vld [vmem:[%s2619_s19 + $0x68] sm:$0xff] }
  0xcc   : > { %v488_v50 = vpop.permute.xlu1 %487  ;;  %v485_v51 = vpop.permute.xlu0 %484 }
  0xcd   : > { %vm520_vm0 = vcmp.eq.s32.totalorder %v488_v50, %v2506_v35  ;;  %vm519_vm1 = vcmp.eq.s32.totalorder %v485_v51, %v2506_v35  ;;  %2164 = vmatprep.mubr.msk.bf16.mxu0 %vm609_vm4, %v599_v49  ;;  %v2315_v35 = vld [vmem:[%s2885_s5] sm:$0xff]  }
  0xce   : > { %v1994_v52 = vsel %vm520_vm0, 1.0, %v2404_v40  ;;  %v1993_v53 = vsel %vm519_vm1, 1.0, %v2404_v40  ;;  %v2316_v40 = vld [vmem:[%s2885_s5 + $0x8] sm:$0xff]   ;;  %2204 = vmatprep.subr.bf16.mxu0 %v2315_v35 }
  0xcf   : > { %v600_v54 = vpack.c.bf16 %v1994_v52, %v1993_v53  ;;  %2205 = vmatpush3.bf16.msra.mxu0 %v2315_v35  ;;  %v837_v35 = vld [vmem:[%s2619_s19 + $0x90] sm:$0xff] }
  0xd0   : > { %2206 = vmatprep.subr.bf16.mxu0 %v2316_v40 }
  0xd2   : > { %2165 = vmatmul.mubr.msk.bf16.gmra.mrb[28].mxu0 %vm609_vm4, %v600_v54  ;;  %vm922_vm4 = vcmask 261120  }
  0xd3   : > { %2207 = vmatpush3.bf16.msra.mxu0 %v2316_v40  ;;  %v838_v40 = vld [vmem:[%s2619_s19 + $0x98] sm:$0xff] }
  0xd4   : > { %2208 = vmatprep.subr.bf16.mxu0 %v2317_v57 }
  0xd7   : > { %2209 = vmatpush3.bf16.msra.mxu0 %v2317_v57 }
  0xd8   : > { %2210 = vmatprep.subr.bf16.mxu0 %v2318_v58 }
  0xdb   : > { %2211 = vmatpush3.bf16.msra.mxu0 %v2318_v58  ;;  %v835_v58 = vld [vmem:[%s2619_s19 + $0x80] sm:$0xff] }
  0xdc   : > { %2212 = vmatprep.subr.bf16.mxu0 %v2319_v59 }
  0xdf   : > { %2213 = vmatpush3.bf16.msra.mxu0 %v2319_v59  ;;  %v836_v59 = vld [vmem:[%s2619_s19 + $0x88] sm:$0xff] }
  0xe0   : > { %2214 = vmatprep.subr.bf16.mxu0 %v2320_v60 }
  0xe3   : > { %2215 = vmatpush3.bf16.msra.mxu0 %v2320_v60 }
  0xe4   : > { %2216 = vmatprep.subr.bf16.mxu0 %v2321_v61 }
  0xe7   : > { %2217 = vmatpush3.bf16.msra.mxu0 %v2321_v61 }
 0x16d   : > { %v2138_v62 = vpop.f32.mrb[0].mxu0 }
 0x16e   : > { %v692_v1 = vpop.f32.mrb[1].mxu0  ;;  %v853_v5 = vmul.f32 %v2138_v62, %v821_v63 }
 0x16f   : > { %v2139_v4 = vpop.f32.mrb[2].mxu0  ;;  %v851_v8 = vmul.f32 %v819_v2, %v692_v1 }
 0x170   : > { %v854_v6 = vmul.f32 %v2139_v4, %v822_v0  ;;  %v695_v7 = vpop.f32.mrb[3].mxu0 }
 0x171   : > { %v852_v9 = vmul.f32 %v820_v3, %v695_v7 }
 0x172   : > { %v884_v10 = vpack.c.bf16 %v854_v6, %v853_v5  ;;  %v841_v5 = vld [vmem:[%s2619_s19 + $0xb0] sm:$0xff]  ;;  %v842_v6 = vld [vmem:[%s2619_s19 + $0xb8] sm:$0xff] }
 0x173   : > { %v883_v11 = vpack.c.bf16 %v852_v9, %v851_v8  ;;  %v839_v8 = vld [vmem:[%s2619_s19 + $0xa0] sm:$0xff]  ;;  %v840_v9 = vld [vmem:[%s2619_s19 + $0xa8] sm:$0xff] }
 0x175   : > { %v2142_v12 = vpop.f32.mrb[4].mxu0  ;;  %2172 = vmatprep.mubr.msk.bf16.mxu1 %vm922_vm4, %v883_v11 }
 0x176   : > { %v708_v15 = vpop.f32.mrb[5].mxu0  ;;  %2173 = vmatmul.mubr.msk.bf16.vlgmr.msra.gmra.mrb[0].mxu1 %vm922_vm4, %v884_v10  ;;  %v857_v19 = vmul.f32 %v2142_v12, %v825_v13 }
 0x177   : > { %v2143_v18 = vpop.f32.mrb[6].mxu0  ;;  %v855_v22 = vmul.f32 %v823_v16, %v708_v15 }
 0x178   : > { %v858_v20 = vmul.f32 %v2143_v18, %v826_v14  ;;  %v711_v21 = vpop.f32.mrb[7].mxu0 }
 0x179   : > { %v856_v23 = vmul.f32 %v824_v17, %v711_v21 }
 0x17a   : > { %v886_v24 = vpack.c.bf16 %v858_v20, %v857_v19  ;;  %v845_v19 = vld [vmem:[%s2619_s19 + $0xd0] sm:$0xff]  ;;  %v846_v20 = vld [vmem:[%s2619_s19 + $0xd8] sm:$0xff] }
 0x17b   : > { %v885_v25 = vpack.c.bf16 %v856_v23, %v855_v22  ;;  %v843_v22 = vld [vmem:[%s2619_s19 + $0xc0] sm:$0xff]  ;;  %v844_v23 = vld [vmem:[%s2619_s19 + $0xc8] sm:$0xff] }
 0x17d   : > { %v2146_v26 = vpop.f32.mrb[8].mxu0  ;;  %2176 = vmatprep.mubr.msk.bf16.mxu1 %vm922_vm4, %v885_v25 }
 0x17e   : > { %v724_v29 = vpop.f32.mrb[9].mxu0  ;;  %2177 = vmatmul.mubr.msk.bf16.gmra.mrb[4].mxu1 %vm922_vm4, %v886_v24  ;;  %v861_v33 = vmul.f32 %v2146_v26, %v829_v27 }
 0x17f   : > { %v2147_v32 = vpop.f32.mrb[10].mxu0  ;;  %v859_v37 = vmul.f32 %v827_v30, %v724_v29 }
 0x180   : > { %v862_v34 = vmul.f32 %v2147_v32, %v830_v28  ;;  %v727_v36 = vpop.f32.mrb[11].mxu0 }
 0x181   : > { %v860_v38 = vmul.f32 %v828_v31, %v727_v36 }
 0x182   : > { %v888_v39 = vpack.c.bf16 %v862_v34, %v861_v33  ;;  %v849_v33 = vld [vmem:[%s2619_s19 + $0xf0] sm:$0xff]  ;;  %v850_v34 = vld [vmem:[%s2619_s19 + $0xf8] sm:$0xff] }
 0x183   : > { %v887_v41 = vpack.c.bf16 %v860_v38, %v859_v37  ;;  %v847_v37 = vld [vmem:[%s2619_s19 + $0xe0] sm:$0xff]  ;;  %v848_v38 = vld [vmem:[%s2619_s19 + $0xe8] sm:$0xff] }
 0x185   : > { %v2150_v42 = vpop.f32.mrb[12].mxu0  ;;  %2180 = vmatprep.mubr.msk.bf16.mxu1 %vm922_vm4, %v887_v41 }
 0x186   : > { %v740_v45 = vpop.f32.mrb[13].mxu0  ;;  %2181 = vmatmul.mubr.msk.bf16.gmra.mrb[8].mxu1 %vm922_vm4, %v888_v39  ;;  %v865_v49 = vmul.f32 %v2150_v42, %v833_v43 }
 0x187   : > { %v2151_v48 = vpop.f32.mrb[14].mxu0  ;;  %v863_v52 = vmul.f32 %v831_v46, %v740_v45 }
 0x188   : > { %v866_v50 = vmul.f32 %v2151_v48, %v834_v44  ;;  %v743_v51 = vpop.f32.mrb[15].mxu0  ;;  %v2322_v48 = vld [vmem:[%s2885_s5 + $0x38] sm:$0xff]  }
 0x189   : > { %v864_v53 = vmul.f32 %v832_v47, %v743_v51  ;;  %2218 = vmatprep.subr.bf16.mxu0 %v2322_v48  ;;  %v2325_v51 = vld [vmem:[%s2887_s7 + $0x10] sm:$0xff]  }
 0x18a   : > { %v890_v54 = vpack.c.bf16 %v866_v50, %v865_v49  ;;  %2219 = vmatpush3.bf16.msra.mxu0 %v2322_v48  ;;  %v2323_v49 = vld [vmem:[%s2887_s7] sm:$0xff]   ;;  %v2324_v50 = vld [vmem:[%s2887_s7 + $0x8] sm:$0xff]  }
 0x18b   : > { %v889_v55 = vpack.c.bf16 %v864_v53, %v863_v52  ;;  %2252 = vmatprep.subr.bf16.mxu1 %v2323_v49  ;;  %v2326_v52 = vld [vmem:[%s2887_s7 + $0x18] sm:$0xff]   ;;  %v2327_v53 = vld [vmem:[%s2887_s7 + $0x20] sm:$0xff]  }
 0x18c   : > { %2253 = vmatpush3.bf16.msra.mxu1 %v2323_v49 }
 0x18d   : > { %v2154_v56 = vpop.f32.mrb[16].mxu0  ;;  %2184 = vmatprep.mubr.msk.bf16.mxu1 %vm922_vm4, %v889_v55  ;;  %2254 = vmatprep.subr.bf16.mxu1 %v2324_v50  ;;  %v2329_v55 = vld [vmem:[%s2887_s7 + $0x30] sm:$0xff]  }
 0x18e   : > { %v756_v57 = vpop.f32.mrb[17].mxu0  ;;  %2185 = vmatmul.mubr.msk.bf16.gmra.mrb[12].mxu1 %vm922_vm4, %v890_v54  ;;  %v869_v61 = vmul.f32 %v2154_v56, %v837_v35  ;;  %v2328_v54 = vld [vmem:[%s2887_s7 + $0x28] sm:$0xff]   ;;  %v2696_v56 = vld [vmem:[%s2884_s4] ss:$0 sm:$0xff] }
 0x18f   : > { %v2155_v60 = vpop.f32.mrb[18].mxu0  ;;  %v867_v0 = vmul.f32 %v835_v58, %v756_v57 }
 0x190   : > { %v870_v62 = vmul.f32 %v2155_v60, %v838_v40  ;;  %v759_v63 = vpop.f32.mrb[19].mxu0  ;;  %2255 = vmatpush3.bf16.msra.mxu1 %v2324_v50 }
 0x191   : > { %v868_v1 = vmul.f32 %v836_v59, %v759_v63  ;;  %2256 = vmatprep.subr.bf16.mxu1 %v2325_v51 }
 0x192   : > { %v892_v2 = vpack.c.bf16 %v870_v62, %v869_v61 }
 0x193   : > { %v891_v3 = vpack.c.bf16 %v868_v1, %v867_v0 }
 0x194   : > { %2257 = vmatpush3.bf16.msra.mxu1 %v2325_v51 }
 0x195   : > { %v2158_v4 = vpop.f32.mrb[20].mxu0  ;;  %2188 = vmatprep.mubr.msk.bf16.mxu1 %vm922_vm4, %v891_v3  ;;  %2258 = vmatprep.subr.bf16.mxu1 %v2326_v52 }
 0x196   : > { %v772_v7 = vpop.f32.mrb[21].mxu0  ;;  %2189 = vmatmul.mubr.msk.bf16.gmra.mrb[16].mxu1 %vm922_vm4, %v892_v2  ;;  %v873_v11 = vmul.f32 %v2158_v4, %v841_v5 }
 0x197   : > { %v2159_v10 = vpop.f32.mrb[22].mxu0  ;;  %v871_v14 = vmul.f32 %v839_v8, %v772_v7 }
 0x198   : > { %v874_v12 = vmul.f32 %v2159_v10, %v842_v6  ;;  %v775_v13 = vpop.f32.mrb[23].mxu0  ;;  %2259 = vmatpush3.bf16.msra.mxu1 %v2326_v52 }
 0x199   : > { %v872_v15 = vmul.f32 %v840_v9, %v775_v13  ;;  %2260 = vmatprep.subr.bf16.mxu1 %v2327_v53 }
 0x19a   : > { %v894_v16 = vpack.c.bf16 %v874_v12, %v873_v11 }
 0x19b   : > { %v893_v17 = vpack.c.bf16 %v872_v15, %v871_v14 }
 0x19c   : > { %2261 = vmatpush3.bf16.msra.mxu1 %v2327_v53 }
 0x19d   : > { %v2162_v18 = vpop.f32.mrb[24].mxu0  ;;  %2192 = vmatprep.mubr.msk.bf16.mxu1 %vm922_vm4, %v893_v17  ;;  %2262 = vmatprep.subr.bf16.mxu1 %v2328_v54 }
 0x19e   : > { %v788_v21 = vpop.f32.mrb[25].mxu0  ;;  %2193 = vmatmul.mubr.msk.bf16.gmra.mrb[20].mxu1 %vm922_vm4, %v894_v16  ;;  %v877_v25 = vmul.f32 %v2162_v18, %v845_v19 }
 0x19f   : > { %v2163_v24 = vpop.f32.mrb[26].mxu0  ;;  %v875_v28 = vmul.f32 %v843_v22, %v788_v21 }
 0x1a0   : > { %v878_v26 = vmul.f32 %v2163_v24, %v846_v20  ;;  %v791_v27 = vpop.f32.mrb[27].mxu0  ;;  %2263 = vmatpush3.bf16.msra.mxu1 %v2328_v54 }
 0x1a1   : > { %v876_v29 = vmul.f32 %v844_v23, %v791_v27  ;;  %2264 = vmatprep.subr.bf16.mxu1 %v2329_v55 }
 0x1a2   : > { %v896_v30 = vpack.c.bf16 %v878_v26, %v877_v25 }
 0x1a3   : > { %v895_v31 = vpack.c.bf16 %v876_v29, %v875_v28 }
 0x1a4   : > { %2265 = vmatpush3.bf16.msra.mxu1 %v2329_v55 }
 0x1a5   : > { %v2166_v32 = vpop.f32.mrb[28].mxu0  ;;  %2196 = vmatprep.mubr.msk.bf16.mxu1 %vm922_vm4, %v895_v31 }
 0x1a6   : > { %v804_v36 = vpop.f32.mrb[29].mxu0  ;;  %2197 = vmatmul.mubr.msk.bf16.gmra.mrb[24].mxu1 %vm922_vm4, %v896_v30  ;;  %v881_v41 = vmul.f32 %v2166_v32, %v849_v33 }
 0x1a7   : > { %v2167_v39 = vpop.f32.mrb[30].mxu0  ;;  %v879_v44 = vmul.f32 %v847_v37, %v804_v36 }
 0x1a8   : > { %v882_v42 = vmul.f32 %v2167_v39, %v850_v34  ;;  %v807_v43 = vpop.f32.mrb[31].mxu0 }
 0x1a9   : > { %v880_v45 = vmul.f32 %v848_v38, %v807_v43 }
 0x1aa   : > { %v898_v46 = vpack.c.bf16 %v882_v42, %v881_v41 }
 0x1ab   : > { %v897_v47 = vpack.c.bf16 %v880_v45, %v879_v44 }
 0x1ad   : > { %2200 = vmatprep.mubr.msk.bf16.mxu1 %vm922_vm4, %v897_v47 }
 0x1ae   : > { %2201 = vmatmul.mubr.msk.bf16.gmra.mrb[28].mxu1 %vm922_vm4, %v898_v46 }
 0x249   : > { %v2174_v35 = vpop.f32.mrb[0].mxu1 }
 0x24a   : > { %v1014_v40 = vadd.f32 %v2174_v35, %v2696_v56  ;;  %v1005_v57 = vpop.f32.mrb[1].mxu1 }
 0x24b   : > { %v1006_v58 = vadd.f32 %v2696_v56, %v1005_v57  ;;  %v2175_v59 = vpop.f32.mrb[2].mxu1 }
 0x24c   : > { %v1166_v60 = vmul.f32 0.2, %v1014_v40  ;;  %v1017_v61 = vadd.f32 %v2175_v59, %v2696_v56  ;;  %v1008_v62 = vpop.f32.mrb[3].mxu1  ;;  %vm1134_vm2 = vcmp.gt.f32.partialorder %v1014_v40, 0.0 }
 0x24d   : > { %v1164_v63 = vmul.f32 0.2, %v1006_v58  ;;  %v1009_v0 = vadd.f32 %v2696_v56, %v1008_v62  ;;  %vm1132_vm3 = vcmp.gt.f32.partialorder %v1006_v58, 0.0 }
 0x24e   : > { %vm1135_vm5 = vcmp.gt.f32.partialorder %v1017_v61, 0.0  ;;  %v1167_v1 = vmul.f32 0.2, %v1017_v61  ;;  %v1198_v3 = vsel %vm1134_vm2, %v1014_v40, %v1166_v60 }
 0x24f   : > { %vm1133_vm6 = vcmp.gt.f32.partialorder %v1009_v0, 0.0  ;;  %v1165_v2 = vmul.f32 0.2, %v1009_v0  ;;  %v1196_v7 = vsel %vm1132_vm3, %v1006_v58, %v1164_v63 }
 0x250   : > { %v1199_v4 = vsel %vm1135_vm5, %v1017_v61, %v1167_v1 }
 0x251   : > { %v1229_v5 = vpack.c.bf16 %v1199_v4, %v1198_v3  ;;  %v2178_v6 = vpop.f32.mrb[4].mxu1  ;;  %v1197_v8 = vsel %vm1133_vm6, %v1009_v0, %v1165_v2 }
 0x252   : > { %v1030_v9 = vadd.f32 %v2178_v6, %v2696_v56  ;;  %v1021_v10 = vpop.f32.mrb[5].mxu1  ;;  %v1228_v11 = vpack.c.bf16 %v1197_v8, %v1196_v7 }
 0x253   : > { %v1022_v12 = vadd.f32 %v2696_v56, %v1021_v10  ;;  %v2179_v13 = vpop.f32.mrb[6].mxu1 }
 0x254   : > { %v1170_v14 = vmul.f32 0.2, %v1030_v9  ;;  %v1033_v15 = vadd.f32 %v2179_v13, %v2696_v56  ;;  %v1024_v16 = vpop.f32.mrb[7].mxu1  ;;  %2220 = vmatprep.mubr.bf16.mxu0 %v1228_v11  ;;  %vm1138_vm7 = vcmp.gt.f32.partialorder %v1030_v9, 0.0 }
 0x255   : > { %v1168_v17 = vmul.f32 0.2, %v1022_v12  ;;  %v1025_v18 = vadd.f32 %v2696_v56, %v1024_v16  ;;  %2221 = vmatmul.mubr.bf16.vlgmr.msra.gmra.mrb[32].mxu0 %v1229_v5  ;;  %vm1136_vm8 = vcmp.gt.f32.partialorder %v1022_v12, 0.0 }
 0x256   : > { %vm1139_vm9 = vcmp.gt.f32.partialorder %v1033_v15, 0.0  ;;  %v1171_v19 = vmul.f32 0.2, %v1033_v15  ;;  %v1202_v21 = vsel %vm1138_vm7, %v1030_v9, %v1170_v14 }
 0x257   : > { %vm1137_vm10 = vcmp.gt.f32.partialorder %v1025_v18, 0.0  ;;  %v1169_v20 = vmul.f32 0.2, %v1025_v18  ;;  %v1200_v24 = vsel %vm1136_vm8, %v1022_v12, %v1168_v17 }
 0x258   : > { %v1203_v22 = vsel %vm1139_vm9, %v1033_v15, %v1171_v19 }
 0x259   : > { %v2182_v23 = vpop.f32.mrb[8].mxu1  ;;  %v1201_v25 = vsel %vm1137_vm10, %v1025_v18, %v1169_v20  ;;  %v1231_v26 = vpack.c.bf16 %v1203_v22, %v1202_v21 }
 0x25a   : > { %v1046_v27 = vadd.f32 %v2182_v23, %v2696_v56  ;;  %v1037_v28 = vpop.f32.mrb[9].mxu1  ;;  %v1230_v29 = vpack.c.bf16 %v1201_v25, %v1200_v24 }
 0x25b   : > { %v1038_v30 = vadd.f32 %v2696_v56, %v1037_v28  ;;  %v2183_v31 = vpop.f32.mrb[10].mxu1 }
 0x25c   : > { %v1174_v32 = vmul.f32 0.2, %v1046_v27  ;;  %v1049_v33 = vadd.f32 %v2183_v31, %v2696_v56  ;;  %v1040_v34 = vpop.f32.mrb[11].mxu1  ;;  %2224 = vmatprep.mubr.bf16.mxu0 %v1230_v29  ;;  %vm1142_vm11 = vcmp.gt.f32.partialorder %v1046_v27, 0.0 }
 0x25d   : > { %v1172_v36 = vmul.f32 0.2, %v1038_v30  ;;  %v1041_v37 = vadd.f32 %v2696_v56, %v1040_v34  ;;  %2225 = vmatmul.mubr.bf16.gmra.mrb[36].mxu0 %v1231_v26  ;;  %vm1140_vm12 = vcmp.gt.f32.partialorder %v1038_v30, 0.0 }
 0x25e   : > { %vm1143_vm13 = vcmp.gt.f32.partialorder %v1049_v33, 0.0  ;;  %v1175_v38 = vmul.f32 0.2, %v1049_v33  ;;  %v1206_v41 = vsel %vm1142_vm11, %v1046_v27, %v1174_v32 }
 0x25f   : > { %vm1141_vm14 = vcmp.gt.f32.partialorder %v1041_v37, 0.0  ;;  %v1173_v39 = vmul.f32 0.2, %v1041_v37  ;;  %v1204_v44 = vsel %vm1140_vm12, %v1038_v30, %v1172_v36 }
 0x260   : > { %v1207_v42 = vsel %vm1143_vm13, %v1049_v33, %v1175_v38 }
 0x261   : > { %v2186_v43 = vpop.f32.mrb[12].mxu1  ;;  %v1205_v45 = vsel %vm1141_vm14, %v1041_v37, %v1173_v39  ;;  %v1233_v46 = vpack.c.bf16 %v1207_v42, %v1206_v41 }
 0x262   : > { %v1062_v47 = vadd.f32 %v2186_v43, %v2696_v56  ;;  %v1053_v48 = vpop.f32.mrb[13].mxu1  ;;  %v1232_v49 = vpack.c.bf16 %v1205_v45, %v1204_v44 }
 0x263   : > { %v1054_v50 = vadd.f32 %v2696_v56, %v1053_v48  ;;  %v2187_v51 = vpop.f32.mrb[14].mxu1 }
 0x264   : > { %v1178_v52 = vmul.f32 0.2, %v1062_v47  ;;  %v1065_v53 = vadd.f32 %v2187_v51, %v2696_v56  ;;  %v1056_v54 = vpop.f32.mrb[15].mxu1  ;;  %2228 = vmatprep.mubr.bf16.mxu0 %v1232_v49  ;;  %vm1146_vm15 = vcmp.gt.f32.partialorder %v1062_v47, 0.0 }
 0x265   : > { %v1176_v55 = vmul.f32 0.2, %v1054_v50  ;;  %v1057_v35 = vadd.f32 %v2696_v56, %v1056_v54  ;;  %2229 = vmatmul.mubr.bf16.gmra.mrb[40].mxu0 %v1233_v46  ;;  %vm1144_vm0 = vcmp.gt.f32.partialorder %v1054_v50, 0.0 }
 0x266   : > { %vm1147_vm1 = vcmp.gt.f32.partialorder %v1065_v53, 0.0  ;;  %v1179_v40 = vmul.f32 0.2, %v1065_v53  ;;  %v1210_v58 = vsel %vm1146_vm15, %v1062_v47, %v1178_v52 }
 0x267   : > { %vm1145_vm2 = vcmp.gt.f32.partialorder %v1057_v35, 0.0  ;;  %v1177_v57 = vmul.f32 0.2, %v1057_v35  ;;  %v1208_v61 = vsel %vm1144_vm0, %v1054_v50, %v1176_v55 }
 0x268   : > { %v1211_v59 = vsel %vm1147_vm1, %v1065_v53, %v1179_v40 }
 0x269   : > { %v2190_v60 = vpop.f32.mrb[16].mxu1  ;;  %v1209_v62 = vsel %vm1145_vm2, %v1057_v35, %v1177_v57  ;;  %v1235_v63 = vpack.c.bf16 %v1211_v59, %v1210_v58 }
 0x26a   : > { %v1078_v0 = vadd.f32 %v2190_v60, %v2696_v56  ;;  %v1069_v1 = vpop.f32.mrb[17].mxu1  ;;  %v1234_v2 = vpack.c.bf16 %v1209_v62, %v1208_v61 }
 0x26b   : > { %v1070_v3 = vadd.f32 %v2696_v56, %v1069_v1  ;;  %v2191_v4 = vpop.f32.mrb[18].mxu1 }
 0x26c   : > { %v1182_v5 = vmul.f32 0.2, %v1078_v0  ;;  %v1081_v6 = vadd.f32 %v2191_v4, %v2696_v56  ;;  %v1072_v7 = vpop.f32.mrb[19].mxu1  ;;  %2232 = vmatprep.mubr.bf16.mxu0 %v1234_v2  ;;  %vm1150_vm3 = vcmp.gt.f32.partialorder %v1078_v0, 0.0 }
 0x26d   : > { %v1180_v8 = vmul.f32 0.2, %v1070_v3  ;;  %v1073_v9 = vadd.f32 %v2696_v56, %v1072_v7  ;;  %2233 = vmatmul.mubr.bf16.gmra.mrb[44].mxu0 %v1235_v63  ;;  %vm1148_vm5 = vcmp.gt.f32.partialorder %v1070_v3, 0.0 }
 0x26e   : > { %vm1151_vm6 = vcmp.gt.f32.partialorder %v1081_v6, 0.0  ;;  %v1183_v10 = vmul.f32 0.2, %v1081_v6  ;;  %v1214_v12 = vsel %vm1150_vm3, %v1078_v0, %v1182_v5 }
 0x26f   : > { %vm1149_vm7 = vcmp.gt.f32.partialorder %v1073_v9, 0.0  ;;  %v1181_v11 = vmul.f32 0.2, %v1073_v9  ;;  %v1212_v15 = vsel %vm1148_vm5, %v1070_v3, %v1180_v8 }
 0x270   : > { %v1215_v13 = vsel %vm1151_vm6, %v1081_v6, %v1183_v10 }
 0x271   : > { %v2194_v14 = vpop.f32.mrb[20].mxu1  ;;  %v1213_v16 = vsel %vm1149_vm7, %v1073_v9, %v1181_v11  ;;  %v1237_v17 = vpack.c.bf16 %v1215_v13, %v1214_v12  ;;  %v2330_v9 = vld [vmem:[%s2887_s7 + $0x38] sm:$0xff]  }
 0x272   : > { %v1094_v18 = vadd.f32 %v2194_v14, %v2696_v56  ;;  %v1085_v19 = vpop.f32.mrb[21].mxu1  ;;  %v1236_v20 = vpack.c.bf16 %v1213_v16, %v1212_v15  ;;  %2266 = vmatprep.subr.bf16.mxu1 %v2330_v9 }
 0x273   : > { %v1086_v21 = vadd.f32 %v2696_v56, %v1085_v19  ;;  %v2195_v22 = vpop.f32.mrb[22].mxu1  ;;  %2267 = vmatpush3.bf16.msra.mxu1 %v2330_v9 }
 0x274   : > { %v1186_v23 = vmul.f32 0.2, %v1094_v18  ;;  %v1097_v24 = vadd.f32 %v2195_v22, %v2696_v56  ;;  %v1088_v25 = vpop.f32.mrb[23].mxu1  ;;  %2236 = vmatprep.mubr.bf16.mxu0 %v1236_v20  ;;  %vm1154_vm8 = vcmp.gt.f32.partialorder %v1094_v18, 0.0 }
 0x275   : > { %v1184_v26 = vmul.f32 0.2, %v1086_v21  ;;  %v1089_v27 = vadd.f32 %v2696_v56, %v1088_v25  ;;  %2237 = vmatmul.mubr.bf16.gmra.mrb[48].mxu0 %v1237_v17  ;;  %vm1152_vm9 = vcmp.gt.f32.partialorder %v1086_v21, 0.0 }
 0x276   : > { %vm1155_vm10 = vcmp.gt.f32.partialorder %v1097_v24, 0.0  ;;  %v1187_v28 = vmul.f32 0.2, %v1097_v24  ;;  %v1218_v30 = vsel %vm1154_vm8, %v1094_v18, %v1186_v23 }
 0x277   : > { %vm1153_vm11 = vcmp.gt.f32.partialorder %v1089_v27, 0.0  ;;  %v1185_v29 = vmul.f32 0.2, %v1089_v27  ;;  %v1216_v33 = vsel %vm1152_vm9, %v1086_v21, %v1184_v26 }
 0x278   : > { %v1219_v31 = vsel %vm1155_vm10, %v1097_v24, %v1187_v28 }
 0x279   : > { %v2198_v32 = vpop.f32.mrb[24].mxu1  ;;  %v1217_v34 = vsel %vm1153_vm11, %v1089_v27, %v1185_v29  ;;  %v1239_v36 = vpack.c.bf16 %v1219_v31, %v1218_v30 }
 0x27a   : > { %v1110_v37 = vadd.f32 %v2198_v32, %v2696_v56  ;;  %v1101_v38 = vpop.f32.mrb[25].mxu1  ;;  %v1238_v39 = vpack.c.bf16 %v1217_v34, %v1216_v33 }
 0x27b   : > { %v1102_v41 = vadd.f32 %v2696_v56, %v1101_v38  ;;  %v2199_v42 = vpop.f32.mrb[26].mxu1 }
 0x27c   : > { %v1190_v43 = vmul.f32 0.2, %v1110_v37  ;;  %v1113_v44 = vadd.f32 %v2199_v42, %v2696_v56  ;;  %v1104_v45 = vpop.f32.mrb[27].mxu1  ;;  %2240 = vmatprep.mubr.bf16.mxu0 %v1238_v39  ;;  %vm1158_vm12 = vcmp.gt.f32.partialorder %v1110_v37, 0.0 }
 0x27d   : > { %v1188_v46 = vmul.f32 0.2, %v1102_v41  ;;  %v1105_v47 = vadd.f32 %v2696_v56, %v1104_v45  ;;  %2241 = vmatmul.mubr.bf16.gmra.mrb[52].mxu0 %v1239_v36  ;;  %vm1156_vm13 = vcmp.gt.f32.partialorder %v1102_v41, 0.0 }
 0x27e   : > { %vm1159_vm14 = vcmp.gt.f32.partialorder %v1113_v44, 0.0  ;;  %v1191_v48 = vmul.f32 0.2, %v1113_v44  ;;  %v1222_v50 = vsel %vm1158_vm12, %v1110_v37, %v1190_v43 }
 0x27f   : > { %vm1157_vm15 = vcmp.gt.f32.partialorder %v1105_v47, 0.0  ;;  %v1189_v49 = vmul.f32 0.2, %v1105_v47  ;;  %v1220_v53 = vsel %vm1156_vm13, %v1102_v41, %v1188_v46 }
 0x280   : > { %v1223_v51 = vsel %vm1159_vm14, %v1113_v44, %v1191_v48 }
 0x281   : > { %v2202_v52 = vpop.f32.mrb[28].mxu1  ;;  %v1221_v54 = vsel %vm1157_vm15, %v1105_v47, %v1189_v49  ;;  %v1241_v55 = vpack.c.bf16 %v1223_v51, %v1222_v50 }
 0x282   : > { %v1126_v35 = vadd.f32 %v2202_v52, %v2696_v56  ;;  %v1117_v40 = vpop.f32.mrb[29].mxu1  ;;  %v1240_v57 = vpack.c.bf16 %v1221_v54, %v1220_v53 }
 0x283   : > { %v1118_v58 = vadd.f32 %v2696_v56, %v1117_v40  ;;  %v2203_v59 = vpop.f32.mrb[30].mxu1 }
 0x284   : > { %v1194_v60 = vmul.f32 0.2, %v1126_v35  ;;  %v1129_v61 = vadd.f32 %v2203_v59, %v2696_v56  ;;  %v1120_v62 = vpop.f32.mrb[31].mxu1  ;;  %2244 = vmatprep.mubr.bf16.mxu0 %v1240_v57  ;;  %vm1162_vm0 = vcmp.gt.f32.partialorder %v1126_v35, 0.0 }
 0x285   : > { %v1192_v63 = vmul.f32 0.2, %v1118_v58  ;;  %v1121_v0 = vadd.f32 %v2696_v56, %v1120_v62  ;;  %2245 = vmatmul.mubr.bf16.gmra.mrb[56].mxu0 %v1241_v55  ;;  %vm1160_vm1 = vcmp.gt.f32.partialorder %v1118_v58, 0.0  ;;  %v2736_v56 = vld [vmem:[%s2886_s6] ss:$0 sm:$0xff] }
 0x286   : > { %vm1163_vm2 = vcmp.gt.f32.partialorder %v1129_v61, 0.0  ;;  %v1195_v1 = vmul.f32 0.2, %v1129_v61  ;;  %v1226_v3 = vsel %vm1162_vm0, %v1126_v35, %v1194_v60 }
 0x287   : > { %vm1161_vm3 = vcmp.gt.f32.partialorder %v1121_v0, 0.0  ;;  %v1193_v2 = vmul.f32 0.2, %v1121_v0  ;;  %v1224_v5 = vsel %vm1160_vm1, %v1118_v58, %v1192_v63 }
 0x288   : > { %v1227_v4 = vsel %vm1163_vm2, %v1129_v61, %v1195_v1 }
 0x289   : > { %v1225_v6 = vsel %vm1161_vm3, %v1121_v0, %v1193_v2  ;;  %v1243_v7 = vpack.c.bf16 %v1227_v4, %v1226_v3 }
 0x28a   : > { %v1242_v8 = vpack.c.bf16 %v1225_v6, %v1224_v5 }
 0x28c   : > { %2248 = vmatprep.mubr.bf16.mxu0 %v1242_v8 }
 0x28d   : > { %2249 = vmatmul.mubr.bf16.gmra.mrb[60].mxu0 %v1243_v7 }
 0x328   : > { %v2222_v10 = vpop.f32.mrb[32].mxu0 }
 0x329   : > { %v1358_v11 = vadd.f32 %v2222_v10, %v2736_v56  ;;  %v1349_v12 = vpop.f32.mrb[33].mxu0 }
 0x32a   : > { %v1350_v13 = vadd.f32 %v2736_v56, %v1349_v12  ;;  %v2223_v14 = vpop.f32.mrb[34].mxu0 }
 0x32b   : > { %v1510_v15 = vmul.f32 0.2, %v1358_v11  ;;  %v1361_v16 = vadd.f32 %v2223_v14, %v2736_v56  ;;  %v1352_v17 = vpop.f32.mrb[35].mxu0  ;;  %vm1478_vm5 = vcmp.gt.f32.partialorder %v1358_v11, 0.0 }
 0x32c   : > { %v1508_v18 = vmul.f32 0.2, %v1350_v13  ;;  %v1353_v19 = vadd.f32 %v2736_v56, %v1352_v17  ;;  %vm1476_vm6 = vcmp.gt.f32.partialorder %v1350_v13, 0.0 }
 0x32d   : > { %vm1479_vm7 = vcmp.gt.f32.partialorder %v1361_v16, 0.0  ;;  %v1511_v20 = vmul.f32 0.2, %v1361_v16  ;;  %v1542_v22 = vsel %vm1478_vm5, %v1358_v11, %v1510_v15 }
 0x32e   : > { %vm1477_vm8 = vcmp.gt.f32.partialorder %v1353_v19, 0.0  ;;  %v1509_v21 = vmul.f32 0.2, %v1353_v19  ;;  %v1540_v26 = vsel %vm1476_vm6, %v1350_v13, %v1508_v18 }
 0x32f   : > { %v1543_v23 = vsel %vm1479_vm7, %v1361_v16, %v1511_v20 }
 0x330   : > { %v1573_v24 = vpack.c.bf16 %v1543_v23, %v1542_v22  ;;  %v2226_v25 = vpop.f32.mrb[36].mxu0  ;;  %v1541_v27 = vsel %vm1477_vm8, %v1353_v19, %v1509_v21 }
 0x331   : > { %v1374_v28 = vadd.f32 %v2226_v25, %v2736_v56  ;;  %v1365_v29 = vpop.f32.mrb[37].mxu0  ;;  %v1572_v30 = vpack.c.bf16 %v1541_v27, %v1540_v26 }
 0x332   : > { %v1366_v31 = vadd.f32 %v2736_v56, %v1365_v29  ;;  %v2227_v32 = vpop.f32.mrb[38].mxu0 }
 0x333   : > { %v1514_v33 = vmul.f32 0.2, %v1374_v28  ;;  %v1377_v34 = vadd.f32 %v2227_v32, %v2736_v56  ;;  %v1368_v36 = vpop.f32.mrb[39].mxu0  ;;  %2268 = vmatprep.mubr.bf16.mxu1 %v1572_v30  ;;  %vm1482_vm9 = vcmp.gt.f32.partialorder %v1374_v28, 0.0 }
 0x334   : > { %v1512_v37 = vmul.f32 0.2, %v1366_v31  ;;  %v1369_v38 = vadd.f32 %v2736_v56, %v1368_v36  ;;  %2269 = vmatmul.mubr.bf16.vlgmr.msra.gmra.mrb[32].mxu1 %v1573_v24  ;;  %vm1480_vm10 = vcmp.gt.f32.partialorder %v1366_v31, 0.0 }
 0x335   : > { %vm1483_vm11 = vcmp.gt.f32.partialorder %v1377_v34, 0.0  ;;  %v1515_v39 = vmul.f32 0.2, %v1377_v34  ;;  %v1546_v42 = vsel %vm1482_vm9, %v1374_v28, %v1514_v33 }
 0x336   : > { %vm1481_vm12 = vcmp.gt.f32.partialorder %v1369_v38, 0.0  ;;  %v1513_v41 = vmul.f32 0.2, %v1369_v38  ;;  %v1544_v45 = vsel %vm1480_vm10, %v1366_v31, %v1512_v37 }
 0x337   : > { %v1547_v43 = vsel %vm1483_vm11, %v1377_v34, %v1515_v39 }
 0x338   : > { %v2230_v44 = vpop.f32.mrb[40].mxu0  ;;  %v1545_v46 = vsel %vm1481_vm12, %v1369_v38, %v1513_v41  ;;  %v1575_v47 = vpack.c.bf16 %v1547_v43, %v1546_v42 }
 0x339   : > { %v1390_v48 = vadd.f32 %v2230_v44, %v2736_v56  ;;  %v1381_v49 = vpop.f32.mrb[41].mxu0  ;;  %v1574_v50 = vpack.c.bf16 %v1545_v46, %v1544_v45 }
 0x33a   : > { %v1382_v51 = vadd.f32 %v2736_v56, %v1381_v49  ;;  %v2231_v52 = vpop.f32.mrb[42].mxu0 }
 0x33b   : > { %v1518_v53 = vmul.f32 0.2, %v1390_v48  ;;  %v1393_v54 = vadd.f32 %v2231_v52, %v2736_v56  ;;  %v1384_v55 = vpop.f32.mrb[43].mxu0  ;;  %2272 = vmatprep.mubr.bf16.mxu1 %v1574_v50  ;;  %vm1486_vm13 = vcmp.gt.f32.partialorder %v1390_v48, 0.0 }
 0x33c   : > { %v1516_v35 = vmul.f32 0.2, %v1382_v51  ;;  %v1385_v40 = vadd.f32 %v2736_v56, %v1384_v55  ;;  %2273 = vmatmul.mubr.bf16.gmra.mrb[36].mxu1 %v1575_v47  ;;  %vm1484_vm14 = vcmp.gt.f32.partialorder %v1382_v51, 0.0 }
 0x33d   : > { %vm1487_vm15 = vcmp.gt.f32.partialorder %v1393_v54, 0.0  ;;  %v1519_v57 = vmul.f32 0.2, %v1393_v54  ;;  %v1550_v59 = vsel %vm1486_vm13, %v1390_v48, %v1518_v53 }
 0x33e   : > { %vm1485_vm0 = vcmp.gt.f32.partialorder %v1385_v40, 0.0  ;;  %v1517_v58 = vmul.f32 0.2, %v1385_v40  ;;  %v1548_v62 = vsel %vm1484_vm14, %v1382_v51, %v1516_v35 }
 0x33f   : > { %v1551_v60 = vsel %vm1487_vm15, %v1393_v54, %v1519_v57 }
 0x340   : > { %v2234_v61 = vpop.f32.mrb[44].mxu0  ;;  %v1549_v63 = vsel %vm1485_vm0, %v1385_v40, %v1517_v58  ;;  %v1577_v0 = vpack.c.bf16 %v1551_v60, %v1550_v59 }
 0x341   : > { %v1406_v1 = vadd.f32 %v2234_v61, %v2736_v56  ;;  %v1397_v2 = vpop.f32.mrb[45].mxu0  ;;  %v1576_v3 = vpack.c.bf16 %v1549_v63, %v1548_v62 }
 0x342   : > { %v1398_v4 = vadd.f32 %v2736_v56, %v1397_v2  ;;  %v2235_v5 = vpop.f32.mrb[46].mxu0 }
 0x343   : > { %v1522_v6 = vmul.f32 0.2, %v1406_v1  ;;  %v1409_v7 = vadd.f32 %v2235_v5, %v2736_v56  ;;  %v1400_v8 = vpop.f32.mrb[47].mxu0  ;;  %2276 = vmatprep.mubr.bf16.mxu1 %v1576_v3  ;;  %vm1490_vm1 = vcmp.gt.f32.partialorder %v1406_v1, 0.0 }
 0x344   : > { %v1520_v9 = vmul.f32 0.2, %v1398_v4  ;;  %v1401_v10 = vadd.f32 %v2736_v56, %v1400_v8  ;;  %2277 = vmatmul.mubr.bf16.gmra.mrb[40].mxu1 %v1577_v0  ;;  %vm1488_vm2 = vcmp.gt.f32.partialorder %v1398_v4, 0.0 }
 0x345   : > { %vm1491_vm3 = vcmp.gt.f32.partialorder %v1409_v7, 0.0  ;;  %v1523_v11 = vmul.f32 0.2, %v1409_v7  ;;  %v1554_v13 = vsel %vm1490_vm1, %v1406_v1, %v1522_v6 }
 0x346   : > { %vm1489_vm5 = vcmp.gt.f32.partialorder %v1401_v10, 0.0  ;;  %v1521_v12 = vmul.f32 0.2, %v1401_v10  ;;  %v1552_v16 = vsel %vm1488_vm2, %v1398_v4, %v1520_v9 }
 0x347   : > { %v1555_v14 = vsel %vm1491_vm3, %v1409_v7, %v1523_v11 }
 0x348   : > { %v2238_v15 = vpop.f32.mrb[48].mxu0  ;;  %v1553_v17 = vsel %vm1489_vm5, %v1401_v10, %v1521_v12  ;;  %v1579_v18 = vpack.c.bf16 %v1555_v14, %v1554_v13 }
 0x349   : > { %v1422_v19 = vadd.f32 %v2238_v15, %v2736_v56  ;;  %v1413_v20 = vpop.f32.mrb[49].mxu0  ;;  %v1578_v21 = vpack.c.bf16 %v1553_v17, %v1552_v16 }
 0x34a   : > { %v1414_v22 = vadd.f32 %v2736_v56, %v1413_v20  ;;  %v2239_v23 = vpop.f32.mrb[50].mxu0 }
 0x34b   : > { %v1526_v24 = vmul.f32 0.2, %v1422_v19  ;;  %v1425_v25 = vadd.f32 %v2239_v23, %v2736_v56  ;;  %v1416_v26 = vpop.f32.mrb[51].mxu0  ;;  %2280 = vmatprep.mubr.bf16.mxu1 %v1578_v21  ;;  %vm1494_vm6 = vcmp.gt.f32.partialorder %v1422_v19, 0.0 }
 0x34c   : > { %v1524_v27 = vmul.f32 0.2, %v1414_v22  ;;  %v1417_v28 = vadd.f32 %v2736_v56, %v1416_v26  ;;  %2281 = vmatmul.mubr.bf16.gmra.mrb[44].mxu1 %v1579_v18  ;;  %vm1492_vm7 = vcmp.gt.f32.partialorder %v1414_v22, 0.0 }
 0x34d   : > { %vm1495_vm8 = vcmp.gt.f32.partialorder %v1425_v25, 0.0  ;;  %v1527_v29 = vmul.f32 0.2, %v1425_v25  ;;  %v1558_v31 = vsel %vm1494_vm6, %v1422_v19, %v1526_v24 }
 0x34e   : > { %vm1493_vm9 = vcmp.gt.f32.partialorder %v1417_v28, 0.0  ;;  %v1525_v30 = vmul.f32 0.2, %v1417_v28  ;;  %v1556_v34 = vsel %vm1492_vm7, %v1414_v22, %v1524_v27 }
 0x34f   : > { %v1559_v32 = vsel %vm1495_vm8, %v1425_v25, %v1527_v29 }
 0x350   : > { %v2242_v33 = vpop.f32.mrb[52].mxu0  ;;  %v1557_v36 = vsel %vm1493_vm9, %v1417_v28, %v1525_v30  ;;  %v1581_v37 = vpack.c.bf16 %v1559_v32, %v1558_v31  ;;  %v2773_v28 = vld [vmem:[%s2888_s8] ss:$0 sm:$0xff] }
 0x351   : > { %v1438_v38 = vadd.f32 %v2242_v33, %v2736_v56  ;;  %v1429_v39 = vpop.f32.mrb[53].mxu0  ;;  %v1580_v41 = vpack.c.bf16 %v1557_v36, %v1556_v34 }
 0x352   : > { %v1430_v42 = vadd.f32 %v2736_v56, %v1429_v39  ;;  %v2243_v43 = vpop.f32.mrb[54].mxu0 }
 0x353   : > { %v1530_v44 = vmul.f32 0.2, %v1438_v38  ;;  %v1441_v45 = vadd.f32 %v2243_v43, %v2736_v56  ;;  %v1432_v46 = vpop.f32.mrb[55].mxu0  ;;  %2284 = vmatprep.mubr.bf16.mxu1 %v1580_v41  ;;  %vm1498_vm10 = vcmp.gt.f32.partialorder %v1438_v38, 0.0 }
 0x354   : > { %v1528_v47 = vmul.f32 0.2, %v1430_v42  ;;  %v1433_v48 = vadd.f32 %v2736_v56, %v1432_v46  ;;  %2285 = vmatmul.mubr.bf16.gmra.mrb[48].mxu1 %v1581_v37  ;;  %vm1496_vm11 = vcmp.gt.f32.partialorder %v1430_v42, 0.0 }
 0x355   : > { %vm1499_vm12 = vcmp.gt.f32.partialorder %v1441_v45, 0.0  ;;  %v1531_v49 = vmul.f32 0.2, %v1441_v45  ;;  %v1562_v51 = vsel %vm1498_vm10, %v1438_v38, %v1530_v44 }
 0x356   : > { %vm1497_vm13 = vcmp.gt.f32.partialorder %v1433_v48, 0.0  ;;  %v1529_v50 = vmul.f32 0.2, %v1433_v48  ;;  %v1560_v54 = vsel %vm1496_vm11, %v1430_v42, %v1528_v47 }
 0x357   : > { %v1563_v52 = vsel %vm1499_vm12, %v1441_v45, %v1531_v49 }
 0x358   : > { %v2246_v53 = vpop.f32.mrb[56].mxu0  ;;  %v1561_v55 = vsel %vm1497_vm13, %v1433_v48, %v1529_v50  ;;  %v1583_v35 = vpack.c.bf16 %v1563_v52, %v1562_v51 }
 0x359   : > { %v1454_v40 = vadd.f32 %v2246_v53, %v2736_v56  ;;  %v1445_v57 = vpop.f32.mrb[57].mxu0  ;;  %v1582_v58 = vpack.c.bf16 %v1561_v55, %v1560_v54 }
 0x35a   : > { %v1446_v59 = vadd.f32 %v2736_v56, %v1445_v57  ;;  %v2247_v60 = vpop.f32.mrb[58].mxu0 }
 0x35b   : > { %v1534_v61 = vmul.f32 0.2, %v1454_v40  ;;  %v1457_v62 = vadd.f32 %v2247_v60, %v2736_v56  ;;  %v1448_v63 = vpop.f32.mrb[59].mxu0  ;;  %2288 = vmatprep.mubr.bf16.mxu1 %v1582_v58  ;;  %vm1502_vm14 = vcmp.gt.f32.partialorder %v1454_v40, 0.0 }
 0x35c   : > { %v1532_v0 = vmul.f32 0.2, %v1446_v59  ;;  %v1449_v1 = vadd.f32 %v2736_v56, %v1448_v63  ;;  %2289 = vmatmul.mubr.bf16.gmra.mrb[52].mxu1 %v1583_v35  ;;  %vm1500_vm15 = vcmp.gt.f32.partialorder %v1446_v59, 0.0 }
 0x35d   : > { %vm1503_vm0 = vcmp.gt.f32.partialorder %v1457_v62, 0.0  ;;  %v1535_v2 = vmul.f32 0.2, %v1457_v62  ;;  %v1566_v4 = vsel %vm1502_vm14, %v1454_v40, %v1534_v61 }
 0x35e   : > { %vm1501_vm1 = vcmp.gt.f32.partialorder %v1449_v1, 0.0  ;;  %v1533_v3 = vmul.f32 0.2, %v1449_v1  ;;  %v1564_v7 = vsel %vm1500_vm15, %v1446_v59, %v1532_v0 }
 0x35f   : > { %v1567_v5 = vsel %vm1503_vm0, %v1457_v62, %v1535_v2 }
 0x360   : > { %v2250_v6 = vpop.f32.mrb[60].mxu0  ;;  %v1565_v8 = vsel %vm1501_vm1, %v1449_v1, %v1533_v3  ;;  %v1585_v9 = vpack.c.bf16 %v1567_v5, %v1566_v4 }
 0x361   : > { %v1470_v10 = vadd.f32 %v2250_v6, %v2736_v56  ;;  %v1461_v11 = vpop.f32.mrb[61].mxu0  ;;  %v1584_v12 = vpack.c.bf16 %v1565_v8, %v1564_v7 }
 0x362   : > { %v1462_v13 = vadd.f32 %v2736_v56, %v1461_v11  ;;  %v2251_v14 = vpop.f32.mrb[62].mxu0 }
 0x363   : > { %v1538_v15 = vmul.f32 0.2, %v1470_v10  ;;  %v1473_v16 = vadd.f32 %v2251_v14, %v2736_v56  ;;  %v1464_v17 = vpop.f32.mrb[63].mxu0  ;;  %2292 = vmatprep.mubr.bf16.mxu1 %v1584_v12  ;;  %vm1506_vm2 = vcmp.gt.f32.partialorder %v1470_v10, 0.0 }
 0x364   : > { %v1536_v18 = vmul.f32 0.2, %v1462_v13  ;;  %v1465_v19 = vadd.f32 %v2736_v56, %v1464_v17  ;;  %2293 = vmatmul.mubr.bf16.gmra.mrb[56].mxu1 %v1585_v9  ;;  %vm1504_vm3 = vcmp.gt.f32.partialorder %v1462_v13, 0.0 }
 0x365   : > { %vm1507_vm5 = vcmp.gt.f32.partialorder %v1473_v16, 0.0  ;;  %v1539_v20 = vmul.f32 0.2, %v1473_v16  ;;  %v1570_v22 = vsel %vm1506_vm2, %v1470_v10, %v1538_v15 }
 0x366   : > { %vm1505_vm6 = vcmp.gt.f32.partialorder %v1465_v19, 0.0  ;;  %v1537_v21 = vmul.f32 0.2, %v1465_v19  ;;  %v1568_v24 = vsel %vm1504_vm3, %v1462_v13, %v1536_v18 }
 0x367   : > { %v1571_v23 = vsel %vm1507_vm5, %v1473_v16, %v1539_v20 }
 0x368   : > { %v1569_v25 = vsel %vm1505_vm6, %v1465_v19, %v1537_v21  ;;  %v1587_v26 = vpack.c.bf16 %v1571_v23, %v1570_v22 }
 0x369   : > { %v1586_v27 = vpack.c.bf16 %v1569_v25, %v1568_v24 }
 0x36b   : > { %2296 = vmatprep.mubr.bf16.mxu1 %v1586_v27 }
 0x36c   : > { %2297 = vmatmul.mubr.bf16.gmra.mrb[60].mxu1 %v1587_v26 }
 0x407   : > { %v2270_v56 = vpop.f32.mrb[32].mxu1 }
 0x408   : > { %v1702_v29 = vadd.f32 %v2270_v56, %v2773_v28  ;;  %v1693_v30 = vpop.f32.mrb[33].mxu1 }
 0x409   : > { %v1694_v31 = vadd.f32 %v2773_v28, %v1693_v30  ;;  %v2271_v32 = vpop.f32.mrb[34].mxu1 }
 0x40a   : > { %2331 = vtanh.f32 %v1702_v29  ;;  %v1705_v33 = vadd.f32 %v2271_v32, %v2773_v28  ;;  %v1696_v34 = vpop.f32.mrb[35].mxu1 }
 0x40b   : > { %2333 = vtanh.f32 %v1694_v31  ;;  %v1697_v36 = vadd.f32 %v2773_v28, %v1696_v34 }
 0x40c   : > { %2335 = vtanh.f32 %v1705_v33 }
 0x40d   : > { %2337 = vtanh.f32 %v1697_v36 }
 0x40f   : > { %v2274_v37 = vpop.f32.mrb[36].mxu1 }
 0x410   : > { %v1718_v38 = vadd.f32 %v2274_v37, %v2773_v28  ;;  %v1709_v39 = vpop.f32.mrb[37].mxu1 }
 0x411   : > { %v1710_v41 = vadd.f32 %v2773_v28, %v1709_v39  ;;  %v2275_v42 = vpop.f32.mrb[38].mxu1 }
 0x412   : > { %2339 = vtanh.f32 %v1718_v38  ;;  %v1721_v43 = vadd.f32 %v2275_v42, %v2773_v28  ;;  %v1712_v44 = vpop.f32.mrb[39].mxu1 }
 0x413   : > { %2341 = vtanh.f32 %v1710_v41  ;;  %v1713_v45 = vadd.f32 %v2773_v28, %v1712_v44 }
 0x414   : > { %v2332_v46 = vpop.eup %2331  ;;  %2343 = vtanh.f32 %v1721_v43 }
 0x415   : > { %v2334_v47 = vpop.eup %2333  ;;  %1854 = vst.msk [vmem:[%s2785_s27 + $0x10] sm:$0xff] %vm922_vm4, %v2332_v46  ;;  %2345 = vtanh.f32 %v1713_v45 }
 0x416   : > { %v2336_v48 = vpop.eup %2335  ;;  %1852 = vst.msk [vmem:[%s2785_s27] sm:$0xff] %vm922_vm4, %v2334_v47 }
 0x417   : > { %v2338_v49 = vpop.eup %2337  ;;  %1855 = vst.msk [vmem:[%s2785_s27 + $0x18] sm:$0xff] %vm922_vm4, %v2336_v48  ;;  %v2278_v50 = vpop.f32.mrb[40].mxu1 }
 0x418   : > { %1853 = vst.msk [vmem:[%s2785_s27 + $0x8] sm:$0xff] %vm922_vm4, %v2338_v49  ;;  %v1734_v51 = vadd.f32 %v2278_v50, %v2773_v28  ;;  %v1725_v52 = vpop.f32.mrb[41].mxu1 }
 0x419   : > { %v1726_v53 = vadd.f32 %v2773_v28, %v1725_v52  ;;  %v2279_v54 = vpop.f32.mrb[42].mxu1 }
 0x41a   : > { %2347 = vtanh.f32 %v1734_v51  ;;  %v1737_v55 = vadd.f32 %v2279_v54, %v2773_v28  ;;  %v1728_v35 = vpop.f32.mrb[43].mxu1 }
 0x41b   : > { %2349 = vtanh.f32 %v1726_v53  ;;  %v1729_v40 = vadd.f32 %v2773_v28, %v1728_v35 }
 0x41c   : > { %v2340_v57 = vpop.eup %2339  ;;  %2351 = vtanh.f32 %v1737_v55 }
 0x41d   : > { %v2342_v58 = vpop.eup %2341  ;;  %1858 = vst.msk [vmem:[%s2785_s27 + $0x30] sm:$0xff] %vm922_vm4, %v2340_v57  ;;  %2353 = vtanh.f32 %v1729_v40 }
 0x41e   : > { %v2344_v59 = vpop.eup %2343  ;;  %1856 = vst.msk [vmem:[%s2785_s27 + $0x20] sm:$0xff] %vm922_vm4, %v2342_v58 }
 0x41f   : > { %v2346_v60 = vpop.eup %2345  ;;  %1859 = vst.msk [vmem:[%s2785_s27 + $0x38] sm:$0xff] %vm922_vm4, %v2344_v59  ;;  %v2282_v61 = vpop.f32.mrb[44].mxu1 }
 0x420   : > { %1857 = vst.msk [vmem:[%s2785_s27 + $0x28] sm:$0xff] %vm922_vm4, %v2346_v60  ;;  %v1750_v62 = vadd.f32 %v2282_v61, %v2773_v28  ;;  %v1741_v63 = vpop.f32.mrb[45].mxu1 }
 0x421   : > { %v1742_v0 = vadd.f32 %v2773_v28, %v1741_v63  ;;  %v2283_v1 = vpop.f32.mrb[46].mxu1 }
 0x422   : > { %2355 = vtanh.f32 %v1750_v62  ;;  %v1753_v2 = vadd.f32 %v2283_v1, %v2773_v28  ;;  %v1744_v3 = vpop.f32.mrb[47].mxu1 }
 0x423   : > { %2357 = vtanh.f32 %v1742_v0  ;;  %v1745_v4 = vadd.f32 %v2773_v28, %v1744_v3 }
 0x424   : > { %v2348_v5 = vpop.eup %2347  ;;  %2359 = vtanh.f32 %v1753_v2 }
 0x425   : > { %v2350_v6 = vpop.eup %2349  ;;  %1862 = vst.msk [vmem:[%s2785_s27 + $0x50] sm:$0xff] %vm922_vm4, %v2348_v5  ;;  %2361 = vtanh.f32 %v1745_v4 }
 0x426   : > { %v2352_v7 = vpop.eup %2351  ;;  %1860 = vst.msk [vmem:[%s2785_s27 + $0x40] sm:$0xff] %vm922_vm4, %v2350_v6 }
 0x427   : > { %v2354_v8 = vpop.eup %2353  ;;  %1863 = vst.msk [vmem:[%s2785_s27 + $0x58] sm:$0xff] %vm922_vm4, %v2352_v7  ;;  %v2286_v9 = vpop.f32.mrb[48].mxu1 }
 0x428   : > { %1861 = vst.msk [vmem:[%s2785_s27 + $0x48] sm:$0xff] %vm922_vm4, %v2354_v8  ;;  %v1766_v10 = vadd.f32 %v2286_v9, %v2773_v28  ;;  %v1757_v11 = vpop.f32.mrb[49].mxu1 }
 0x429   : > { %v1758_v12 = vadd.f32 %v2773_v28, %v1757_v11  ;;  %v2287_v13 = vpop.f32.mrb[50].mxu1 }
 0x42a   : > { %2363 = vtanh.f32 %v1766_v10  ;;  %v1769_v14 = vadd.f32 %v2287_v13, %v2773_v28  ;;  %v1760_v15 = vpop.f32.mrb[51].mxu1 }
 0x42b   : > { %2365 = vtanh.f32 %v1758_v12  ;;  %v1761_v16 = vadd.f32 %v2773_v28, %v1760_v15 }
 0x42c   : > { %v2356_v17 = vpop.eup %2355  ;;  %2367 = vtanh.f32 %v1769_v14 }
 0x42d   : > { %v2358_v18 = vpop.eup %2357  ;;  %1866 = vst.msk [vmem:[%s2785_s27 + $0x70] sm:$0xff] %vm922_vm4, %v2356_v17  ;;  %2369 = vtanh.f32 %v1761_v16 }
 0x42e   : > { %v2360_v19 = vpop.eup %2359  ;;  %1864 = vst.msk [vmem:[%s2785_s27 + $0x60] sm:$0xff] %vm922_vm4, %v2358_v18 }
 0x42f   : > { %v2362_v20 = vpop.eup %2361  ;;  %1867 = vst.msk [vmem:[%s2785_s27 + $0x78] sm:$0xff] %vm922_vm4, %v2360_v19  ;;  %v2290_v21 = vpop.f32.mrb[52].mxu1 }
 0x430   : > { %1865 = vst.msk [vmem:[%s2785_s27 + $0x68] sm:$0xff] %vm922_vm4, %v2362_v20  ;;  %v1782_v22 = vadd.f32 %v2290_v21, %v2773_v28  ;;  %v1773_v23 = vpop.f32.mrb[53].mxu1 }
 0x431   : > { %v1774_v24 = vadd.f32 %v2773_v28, %v1773_v23  ;;  %v2291_v25 = vpop.f32.mrb[54].mxu1 }
 0x432   : > { %2371 = vtanh.f32 %v1782_v22  ;;  %v1785_v26 = vadd.f32 %v2291_v25, %v2773_v28  ;;  %v1776_v27 = vpop.f32.mrb[55].mxu1 }
 0x433   : > { %2373 = vtanh.f32 %v1774_v24  ;;  %v1777_v56 = vadd.f32 %v2773_v28, %v1776_v27 }
 0x434   : > { %v2364_v29 = vpop.eup %2363  ;;  %2375 = vtanh.f32 %v1785_v26 }
 0x435   : > { %v2366_v30 = vpop.eup %2365  ;;  %1870 = vst.msk [vmem:[%s2785_s27 + $0x90] sm:$0xff] %vm922_vm4, %v2364_v29  ;;  %2377 = vtanh.f32 %v1777_v56 }
 0x436   : > { %v2368_v31 = vpop.eup %2367  ;;  %1868 = vst.msk [vmem:[%s2785_s27 + $0x80] sm:$0xff] %vm922_vm4, %v2366_v30 }
 0x437   : > { %v2370_v32 = vpop.eup %2369  ;;  %1871 = vst.msk [vmem:[%s2785_s27 + $0x98] sm:$0xff] %vm922_vm4, %v2368_v31  ;;  %v2294_v33 = vpop.f32.mrb[56].mxu1 }
 0x438   : > { %1869 = vst.msk [vmem:[%s2785_s27 + $0x88] sm:$0xff] %vm922_vm4, %v2370_v32  ;;  %v1798_v34 = vadd.f32 %v2294_v33, %v2773_v28  ;;  %v1789_v36 = vpop.f32.mrb[57].mxu1 }
 0x439   : > { %v1790_v37 = vadd.f32 %v2773_v28, %v1789_v36  ;;  %v2295_v38 = vpop.f32.mrb[58].mxu1 }
 0x43a   : > { %2379 = vtanh.f32 %v1798_v34  ;;  %v1801_v39 = vadd.f32 %v2295_v38, %v2773_v28  ;;  %v1792_v41 = vpop.f32.mrb[59].mxu1 }
 0x43b   : > { %2381 = vtanh.f32 %v1790_v37  ;;  %v1793_v42 = vadd.f32 %v2773_v28, %v1792_v41 }
 0x43c   : > { %v2372_v43 = vpop.eup %2371  ;;  %2383 = vtanh.f32 %v1801_v39 }
 0x43d   : > { %v2374_v44 = vpop.eup %2373  ;;  %1874 = vst.msk [vmem:[%s2785_s27 + $0xb0] sm:$0xff] %vm922_vm4, %v2372_v43  ;;  %2385 = vtanh.f32 %v1793_v42 }
 0x43e   : > { %v2376_v45 = vpop.eup %2375  ;;  %1872 = vst.msk [vmem:[%s2785_s27 + $0xa0] sm:$0xff] %vm922_vm4, %v2374_v44 }
 0x43f   : > { %v2378_v46 = vpop.eup %2377  ;;  %1875 = vst.msk [vmem:[%s2785_s27 + $0xb8] sm:$0xff] %vm922_vm4, %v2376_v45  ;;  %v2298_v47 = vpop.f32.mrb[60].mxu1 }
 0x440   : > { %1873 = vst.msk [vmem:[%s2785_s27 + $0xa8] sm:$0xff] %vm922_vm4, %v2378_v46  ;;  %v1814_v48 = vadd.f32 %v2298_v47, %v2773_v28  ;;  %v1805_v49 = vpop.f32.mrb[61].mxu1 }
 0x441   : > { %v1806_v50 = vadd.f32 %v2773_v28, %v1805_v49  ;;  %v2299_v51 = vpop.f32.mrb[62].mxu1 }
 0x442   : > { %2387 = vtanh.f32 %v1814_v48  ;;  %v1817_v52 = vadd.f32 %v2299_v51, %v2773_v28  ;;  %v1808_v53 = vpop.f32.mrb[63].mxu1 }
 0x443   : > { %2389 = vtanh.f32 %v1806_v50  ;;  %v1809_v54 = vadd.f32 %v2773_v28, %v1808_v53 }
 0x444   : > { %v2380_v55 = vpop.eup %2379  ;;  %2391 = vtanh.f32 %v1817_v52 }
 0x445   : > { %v2382_v35 = vpop.eup %2381  ;;  %1878 = vst.msk [vmem:[%s2785_s27 + $0xd0] sm:$0xff] %vm922_vm4, %v2380_v55  ;;  %2393 = vtanh.f32 %v1809_v54 }
 0x446   : > { %v2384_v40 = vpop.eup %2383  ;;  %1876 = vst.msk [vmem:[%s2785_s27 + $0xc0] sm:$0xff] %vm922_vm4, %v2382_v35 }
 0x447   : > { %v2386_v57 = vpop.eup %2385  ;;  %1879 = vst.msk [vmem:[%s2785_s27 + $0xd8] sm:$0xff] %vm922_vm4, %v2384_v40 }
 0x448   : > { %1877 = vst.msk [vmem:[%s2785_s27 + $0xc8] sm:$0xff] %vm922_vm4, %v2386_v57 }
 0x44c   : > { %v2388_v58 = vpop.eup %2387 }
 0x44d   : > { %v2390_v59 = vpop.eup %2389  ;;  %1882 = vst.msk [vmem:[%s2785_s27 + $0xf0] sm:$0xff] %vm922_vm4, %v2388_v58 }
 0x44e   : > { %v2392_v28 = vpop.eup %2391  ;;  %1880 = vst.msk [vmem:[%s2785_s27 + $0xe0] sm:$0xff] %vm922_vm4, %v2390_v59 }
 0x44f   : > { %v2394_v60 = vpop.eup %2393  ;;  %1883 = vst.msk [vmem:[%s2785_s27 + $0xf8] sm:$0xff] %vm922_vm4, %v2392_v28 }
 0x450   : > { %1881 = vst.msk [vmem:[%s2785_s27 + $0xe8] sm:$0xff] %vm922_vm4, %v2394_v60 }
 0x451 PF: > { %s19_s30 = sadd.s32 1, %s2401_s30  }
 0x452   : > { %p16_p4 = scmp.ge.s32.totalorder %s19_s30, 4  }
 0x454   :  { %18 = sbr.rel (!%p16_p4) target bundleno = 1 (0x1), region = 89 }

</bundles_post_ra>
